<compile_context>
chip_gen: v7x
topology: tpu7x:2x2x1
jax: 0.10.0
libtpu: 0.0.40
codegen_flags: <defaults>
</compile_context>

<pallas_src>
import functools
import math

import jax
import jax.numpy as jnp
from jax import lax
from jax.experimental import pallas as pl
from jax.experimental.pallas import tpu as pltpu


# ----------------------------------------------------------------------------
# Fused forward kernel
# ----------------------------------------------------------------------------
def _layernorm(x, g, b, eps=1e-5):
    mu = jnp.mean(x, axis=-1, keepdims=True)
    var = jnp.mean(jnp.square(x - mu), axis=-1, keepdims=True)
    return (x - mu) * lax.rsqrt(var + eps) * g + b


def _fused_forward_kernel(
        ids_ref, mask_ref, table_ref, pe_ref,
        ln1_g_ref, ln1_b_ref, wqkv_ref, bqkv_ref, wo_ref, bo_ref,
        ln2_g_ref, ln2_b_ref, w1_ref, b1_ref, w2_ref, b2_ref,
        wc_ref, bc_ref,
        logits_ref, attn1_ref, attn2_ref,
        *, btile, seq_len, d_model, vocab, scale, mm_dtype):
    S, D, V = seq_len, d_model, vocab
    T = btile * S                               # flattened (batch-tile * seq) rows

    # ---- Embedder + PositionalEncoder (one-hot gather on the MXU) ----------
    ids = ids_ref[...]                                        # (T, 1) int32
    iota_v = lax.broadcasted_iota(jnp.int32, (T, V), 1)
    onehot = (iota_v == ids).astype(table_ref.dtype)          # (T, V)
    emb = jnp.dot(onehot, table_ref[...],
                  preferred_element_type=jnp.float32)         # (T, D)
    pe = pe_ref[...]                                          # (S, D)
    if btile > 1:
        pe = jnp.tile(pe, (btile, 1))
    x = scale * emb + pe                                      # (T, D) f32

    mask3 = mask_ref[...]                                     # (btile, 1, S)
    attn_refs = (attn1_ref, attn2_ref)

    # ---- 2x TransformerBlock (static unroll; weights stacked on dim 0) -----
    for blk in range(2):
        # LayerNorm 1 (eps=1e-5, biased variance -- PyTorch semantics)
        xn = _layernorm(x, ln1_g_ref[blk], ln1_b_ref[blk])

        # Fused Q|K|V projection: one (T, D) @ (D, 3D) matmul
        qkv = jnp.dot(xn.astype(mm_dtype), wqkv_ref[blk],
                      preferred_element_type=jnp.float32) + bqkv_ref[blk]
        q = qkv[:, :D].reshape(btile, S, D)
        k = qkv[:, D:2 * D].reshape(btile, S, D)
        v = qkv[:, 2 * D:].reshape(btile, S, D)

        # Scaled dot-product attention (d_k = d_model, single head)
        scores = jnp.einsum('bqd,bkd->bqk',
                            q.astype(mm_dtype), k.astype(mm_dtype),
                            preferred_element_type=jnp.float32)
        scores = scores * (1.0 / math.sqrt(D))
        scores = jnp.where(mask3 == 0.0, jnp.float32(-1e9), scores)

        m = jnp.max(scores, axis=-1, keepdims=True)
        p = jnp.exp(scores - m)
        denom = jnp.sum(p, axis=-1, keepdims=True)
        w = p * pl.reciprocal(denom, approx=True)             # softmax weights (f32)

        attn = jnp.einsum('bqk,bkd->bqd',
                          w.astype(mm_dtype), v.astype(mm_dtype),
                          preferred_element_type=jnp.float32)
        attn_out = jnp.dot(attn.reshape(T, D).astype(mm_dtype), wo_ref[blk],
                           preferred_element_type=jnp.float32) + bo_ref[blk]

        x2 = x + attn_out                       # dropout_1 = identity (eval)

        # LayerNorm 2 + FeedForward
        xn2 = _layernorm(x2, ln2_g_ref[blk], ln2_b_ref[blk])
        h = jnp.dot(xn2.astype(mm_dtype), w1_ref[blk],
                    preferred_element_type=jnp.float32) + b1_ref[blk]
        h = jnp.maximum(h, 0.0)
        ff = jnp.dot(h.astype(mm_dtype), w2_ref[blk],
                     preferred_element_type=jnp.float32) + b2_ref[blk]
        x = x2 + ff                             # dropout_2 = identity (eval)

        attn_refs[blk][...] = w                 # (btile, S, S) normalized weights

    # ---- ClassificationHead on token 0 only ---------------------------------
    if btile == 1:
        x0 = x[0:1, :]                          # (1, D) -- first-token row
    else:
        x0 = x.reshape(btile, S, D)[:, 0, :]    # (btile, D)
    logits = (jnp.dot(x0, wc_ref[...], preferred_element_type=jnp.float32)
              + bc_ref[...])                    # (btile, opad) lane-dense
    logits_ref[...] = logits.reshape(btile, 1, -1)


def _const_spec(a):
    nd = a.ndim
    return pl.BlockSpec(a.shape, lambda b, _nd=nd: (0,) * _nd)


def transformer_classification_forward(ids, mask, params, *, btile=None,
                                        mm_dtype=jnp.bfloat16):
    """Full fused forward. Returns (logits [B,out], attn1 [B,S,S], attn2 [B,S,S])."""
    B, S = ids.shape
    V, D = params["table"].shape
    d_ff = params["block1"]["w1"].shape[1]
    out_dim = params["wc"].shape[1]
    opad = ((out_dim + 127) // 128) * 128       # lane-dense padded head output

    if btile is None:
        # Prefer >= 2 grid points when B >= 2 (keeps both v7x TCs busy) while
        # growing the tile toward M = btile*S >= 128 for MXU utilization.
        want_mxu = max(1, -(-128 // S))
        cap_parallel = max(1, B // 2) if B >= 2 else B
        btile = min(cap_parallel, want_mxu, B)
        while B % btile:
            btile -= 1
    assert B % btile == 0
    assert (btile * S) % 8 == 0 or btile * S == B * S, \
        "batch-tile * seq_len must be sublane-aligned"

    # ---- pack / cast parameters --------------------------------------------
    b1p, b2p = params["block1"], params["block2"]

    def stack(name, dtype=jnp.float32):
        return jnp.stack([b1p[name], b2p[name]]).astype(dtype)

    wqkv = jnp.stack([jnp.concatenate([p["wq"], p["wk"], p["wv"]], axis=1)
                      for p in (b1p, b2p)]).astype(mm_dtype)       # (2, D, 3D)
    bqkv = jnp.stack([jnp.concatenate([p["bq"], p["bk"], p["bv"]], axis=1)
                      for p in (b1p, b2p)])                        # (2, 1, 3D) f32
    wo = stack("wo", mm_dtype); bo = stack("bo")
    w1 = stack("w1", mm_dtype); b1 = stack("b1")
    w2 = stack("w2", mm_dtype); b2 = stack("b2")
    ln1_g = stack("ln1_g"); ln1_b = stack("ln1_b")
    ln2_g = stack("ln2_g"); ln2_b = stack("ln2_b")

    wc = jnp.zeros((D, opad), jnp.float32).at[:, :out_dim].set(params["wc"])
    bc = jnp.zeros((1, opad), jnp.float32).at[:, :out_dim].set(params["bc"])

    table = params["table"].astype(jnp.float32)
    pe = params["pe"][:S].astype(jnp.float32)
    # Clamp ids to [0, V-1]: avoids any OOB access (remaps bad tokens).
    ids_col = jnp.clip(ids.astype(jnp.int32), 0, V - 1).reshape(B * S, 1)
    mask3 = mask.astype(jnp.float32)[:, None, :]                   # (B, 1, S)

    weights = [ln1_g, ln1_b, wqkv, bqkv, wo, bo, ln2_g, ln2_b,
               w1, b1, w2, b2, wc, bc]

    # ---- advisory cost estimate ---------------------------------------------
    per_block_flops = (2 * S * D * 3 * D          # fused QKV projection
                       + 2 * S * S * D * 2        # scores + attn@V
                       + 2 * S * D * D            # output projection
                       + 2 * S * D * d_ff * 2)    # FFN
    flops = B * (2 * S * V * D + 2 * per_block_flops + 2 * D * opad)
    transcendentals = B * (2 * S * S + 8 * S)     # exp + rsqrt/reciprocal (approx)
    in_arrays = [ids_col, mask3, table, pe] + weights
    bytes_accessed = (sum(int(a.size) * a.dtype.itemsize for a in in_arrays)
                      + (B * opad + 2 * B * S * S) * 4)

    kernel = functools.partial(
        _fused_forward_kernel, btile=btile, seq_len=S, d_model=D, vocab=V,
        scale=float(math.sqrt(D)), mm_dtype=mm_dtype)

    logits_pad, attn1, attn2 = pl.pallas_call(
        kernel,
        out_shape=(
            jax.ShapeDtypeStruct((B, 1, opad), jnp.float32),
            jax.ShapeDtypeStruct((B, S, S), jnp.float32),
            jax.ShapeDtypeStruct((B, S, S), jnp.float32),
        ),
        grid_spec=pl.GridSpec(
            grid=(B // btile,),
            in_specs=[
                pl.BlockSpec((btile * S, 1), lambda b: (b, 0)),      # token ids
                pl.BlockSpec((btile, 1, S), lambda b: (b, 0, 0)),    # attention mask
                _const_spec(table),
                _const_spec(pe),
            ] + [_const_spec(a) for a in weights],
            out_specs=[
                pl.BlockSpec((btile, 1, opad), lambda b: (b, 0, 0)),  # padded logits
                pl.BlockSpec((btile, S, S), lambda b: (b, 0, 0)),     # attn weights 1
                pl.BlockSpec((btile, S, S), lambda b: (b, 0, 0)),     # attn weights 2
            ],
        ),
        compiler_params=pltpu.CompilerParams(
            dimension_semantics=("parallel",)),
        cost_estimate=pl.CostEstimate(
            flops=int(flops), transcendentals=int(transcendentals),
            bytes_accessed=int(bytes_accessed)),
    )(ids_col, mask3, table, pe, *weights)

    logits = logits_pad[:, 0, :out_dim]
    return logits, attn1, attn2


# ----------------------------------------------------------------------------
# Pure-JAX reference (mirrors the PyTorch module, eval-mode dropout)
# ----------------------------------------------------------------------------
def _layernorm_ref(x, g, b, eps=1e-5):
    mu = jnp.mean(x, axis=-1, keepdims=True)
    var = jnp.mean((x - mu) ** 2, axis=-1, keepdims=True)
    return (x - mu) / jnp.sqrt(var + eps) * g + b


def _block_ref(x, mask, p):
    d_model = x.shape[-1]
    xn = _layernorm_ref(x, p["ln1_g"], p["ln1_b"])
    q = xn @ p["wq"] + p["bq"]
    k = xn @ p["wk"] + p["bk"]
    v = xn @ p["wv"] + p["bv"]
    s = jnp.einsum("bqd,bkd->bqk", q, k) / math.sqrt(d_model)
    s = jnp.where(mask[:, None, :] == 0.0, -1e9, s)
    w = jax.nn.softmax(s, axis=-1)
    attn = jnp.einsum("bqk,bkd->bqd", w, v)
    out = attn @ p["wo"] + p["bo"]
    x2 = x + out
    xn2 = _layernorm_ref(x2, p["ln2_g"], p["ln2_b"])
    h = jax.nn.relu(xn2 @ p["w1"] + p["b1"])
    ff = h @ p["w2"] + p["b2"]
    return x2 + ff, w


def reference_forward(ids, mask, params):
    table, pe = params["table"], params["pe"]
    D = table.shape[1]
    S = ids.shape[1]
    x = table[ids]
    x = math.sqrt(D) * x + pe[:S][None]
    x, w1 = _block_ref(x, mask, params["block1"])
    x, w2 = _block_ref(x, mask, params["block2"])
    logits = x[:, 0, :] @ params["wc"] + params["bc"]
    return logits, w1, w2


# ----------------------------------------------------------------------------
# Parameter construction
# ----------------------------------------------------------------------------
def build_positional_encoding(max_seq_len, d_model):
    pos = jnp.arange(max_seq_len, dtype=jnp.float32)[:, None]
    col = jnp.arange(d_model, dtype=jnp.float32)[None, :]
    angle = pos / jnp.power(10000.0, 2.0 * col / d_model)
    col_int = jnp.arange(d_model, dtype=jnp.int32)[None, :]
    return jnp.where(col_int % 2 == 0, jnp.sin(angle), jnp.cos(angle)
                     ).astype(jnp.float32)


def init_params(key, *, V, d_model, d_ff, output_dim, max_seq_len):
    ks = iter(jax.random.split(key, 32))

    def dense(fan_in, fan_out, std=0.02):
        w = std * jax.random.normal(next(ks), (fan_in, fan_out), jnp.float32)
        b = std * jax.random.normal(next(ks), (1, fan_out), jnp.float32)
        return w, b

    def block_params():
        wq, bq = dense(d_model, d_model)
        wk, bk = dense(d_model, d_model)
        wv, bv = dense(d_model, d_model)
        wo, bo = dense(d_model, d_model)
        w1, b1 = dense(d_model, d_ff)
        w2, b2 = dense(d_ff, d_model)
        return dict(
            ln1_g=jnp.ones((1, d_model), jnp.float32),
            ln1_b=jnp.zeros((1, d_model), jnp.float32),
            wq=wq, bq=bq, wk=wk, bk=bk, wv=wv, bv=bv, wo=wo, bo=bo,
            ln2_g=jnp.ones((1, d_model), jnp.float32),
            ln2_b=jnp.zeros((1, d_model), jnp.float32),
            w1=w1, b1=b1, w2=w2, b2=b2)

    table = jax.random.normal(next(ks), (V, d_model), jnp.float32)
    wc, bc = dense(d_model, output_dim)
    pe = build_positional_encoding(max_seq_len, d_model)
    return dict(table=table, pe=pe, block1=block_params(),
                block2=block_params(), wc=wc, bc=bc)


if __name__ == "__main__":
    key = jax.random.PRNGKey(0)

    # Small, TPU-friendly shapes consistent with the module
    # (d_model is 128 instead of 300 to stay lane-aligned).
    V, D, d_ff = 64, 128, 256
    B, S = 2, 8
    out_dim = 5
    max_seq_len = 140

    params = init_params(key, V=V, d_model=D, d_ff=d_ff,
                         output_dim=out_dim, max_seq_len=max_seq_len)

    k_ids = jax.random.fold_in(key, 123)
    ids = jax.random.randint(k_ids, (B, S), 0, V, dtype=jnp.int32)
    # attention mask: 1.0 = valid token, 0.0 = padding
    mask = jnp.ones((B, S), jnp.float32).at[1, 5:].set(0.0)

    logits, w1, w2 = transformer_classification_forward(ids, mask, params)
    logits = jax.block_until_ready(logits)

    ref_logits, ref_w1, ref_w2 = reference_forward(ids, mask, params)

    assert logits.shape == (B, out_dim)
    assert w1.shape == (B, S, S) and w2.shape == (B, S, S)
    assert jnp.allclose(logits, ref_logits, rtol=2e-2, atol=2e-2), \
        "logits mismatch vs reference"
    assert jnp.allclose(w1, ref_w1, rtol=2e-2, atol=2e-2), \
        "block-1 attention weights mismatch vs reference"
    assert jnp.allclose(w2, ref_w2, rtol=2e-2, atol=2e-2), \
        "block-2 attention weights mismatch vs reference"

    print("KERNEL_OK")
</pallas_src>

<mosaic_0001>
module attributes {stable_mosaic.version = 11 : i64} {
  func.func @_fused_forward_kernel(%arg0: i32, %arg1: memref<8x1xi32, #tpu.memory_space<vmem>>, %arg2: memref<1x1x8xf32, #tpu.memory_space<vmem>>, %arg3: memref<64x128xf32, #tpu.memory_space<vmem>>, %arg4: memref<8x128xf32, #tpu.memory_space<vmem>>, %arg5: memref<2x1x128xf32, #tpu.memory_space<vmem>>, %arg6: memref<2x1x128xf32, #tpu.memory_space<vmem>>, %arg7: memref<2x128x384xbf16, #tpu.memory_space<vmem>>, %arg8: memref<2x1x384xf32, #tpu.memory_space<vmem>>, %arg9: memref<2x128x128xbf16, #tpu.memory_space<vmem>>, %arg10: memref<2x1x128xf32, #tpu.memory_space<vmem>>, %arg11: memref<2x1x128xf32, #tpu.memory_space<vmem>>, %arg12: memref<2x1x128xf32, #tpu.memory_space<vmem>>, %arg13: memref<2x128x256xbf16, #tpu.memory_space<vmem>>, %arg14: memref<2x1x256xf32, #tpu.memory_space<vmem>>, %arg15: memref<2x256x128xbf16, #tpu.memory_space<vmem>>, %arg16: memref<2x1x128xf32, #tpu.memory_space<vmem>>, %arg17: memref<128x128xf32, #tpu.memory_space<vmem>>, %arg18: memref<1x128xf32, #tpu.memory_space<vmem>>, %arg19: memref<1x1x128xf32, #tpu.memory_space<vmem>>, %arg20: memref<1x8x8xf32, #tpu.memory_space<vmem>>, %arg21: memref<1x8x8xf32, #tpu.memory_space<vmem>>) attributes {dimension_semantics = [#tpu.dimension_semantics<parallel>], iteration_bounds = array<i64: 2>, scalar_prefetch = 0 : i64, scratch_operands = 0 : i64, tpu.core_type = #tpu.core_type<tc>, window_params = [{transform_indices = @transform_0, window_bounds = array<i64: 8, 1>}, {transform_indices = @transform_1, window_bounds = array<i64: 1, 1, 8>}, {pipeline_mode = #tpu.pipeline_mode<synchronous>, transform_indices = @transform_2, window_bounds = array<i64: 64, 128>}, {pipeline_mode = #tpu.pipeline_mode<synchronous>, transform_indices = @transform_3, window_bounds = array<i64: 8, 128>}, {pipeline_mode = #tpu.pipeline_mode<synchronous>, transform_indices = @transform_4, window_bounds = array<i64: 2, 1, 128>}, {pipeline_mode = #tpu.pipeline_mode<synchronous>, transform_indices = @transform_5, window_bounds = array<i64: 2, 1, 128>}, {pipeline_mode = #tpu.pipeline_mode<synchronous>, transform_indices = @transform_6, window_bounds = array<i64: 2, 128, 384>}, {pipeline_mode = #tpu.pipeline_mode<synchronous>, transform_indices = @transform_7, window_bounds = array<i64: 2, 1, 384>}, {pipeline_mode = #tpu.pipeline_mode<synchronous>, transform_indices = @transform_8, window_bounds = array<i64: 2, 128, 128>}, {pipeline_mode = #tpu.pipeline_mode<synchronous>, transform_indices = @transform_9, window_bounds = array<i64: 2, 1, 128>}, {pipeline_mode = #tpu.pipeline_mode<synchronous>, transform_indices = @transform_10, window_bounds = array<i64: 2, 1, 128>}, {pipeline_mode = #tpu.pipeline_mode<synchronous>, transform_indices = @transform_11, window_bounds = array<i64: 2, 1, 128>}, {pipeline_mode = #tpu.pipeline_mode<synchronous>, transform_indices = @transform_12, window_bounds = array<i64: 2, 128, 256>}, {pipeline_mode = #tpu.pipeline_mode<synchronous>, transform_indices = @transform_13, window_bounds = array<i64: 2, 1, 256>}, {pipeline_mode = #tpu.pipeline_mode<synchronous>, transform_indices = @transform_14, window_bounds = array<i64: 2, 256, 128>}, {pipeline_mode = #tpu.pipeline_mode<synchronous>, transform_indices = @transform_15, window_bounds = array<i64: 2, 1, 128>}, {pipeline_mode = #tpu.pipeline_mode<synchronous>, transform_indices = @transform_16, window_bounds = array<i64: 128, 128>}, {pipeline_mode = #tpu.pipeline_mode<synchronous>, transform_indices = @transform_17, window_bounds = array<i64: 1, 128>}, {transform_indices = @transform_18, window_bounds = array<i64: 1, 1, 128>}, {transform_indices = @transform_19, window_bounds = array<i64: 1, 8, 8>}, {transform_indices = @transform_20, window_bounds = array<i64: 1, 8, 8>}]} {
    %c0 = arith.constant 0 : index
    %c0_0 = arith.constant 0 : index
    %0 = vector.load %arg1[%c0, %c0_0] : memref<8x1xi32, #tpu.memory_space<vmem>>, vector<8x1xi32>
    %1 = tpu.iota {dimensions = array<i32: 1>} : vector<8x64xi32>
    %2 = vector.broadcast %0 : vector<8x1xi32> to vector<8x64xi32>
    %3 = arith.cmpi eq, %1, %2 : vector<8x64xi32>
    %4 = arith.extui %3 : vector<8x64xi1> to vector<8x64xi32>
    %5 = arith.sitofp %4 : vector<8x64xi32> to vector<8x64xf32>
    %c0_1 = arith.constant 0 : index
    %c0_2 = arith.constant 0 : index
    %6 = vector.load %arg3[%c0_1, %c0_2] : memref<64x128xf32, #tpu.memory_space<vmem>>, vector<64x128xf32>
    %cst = arith.constant dense<0.000000e+00> : vector<8x128xf32>
    %7 = tpu.matmul %5, %6, %cst {dimension_numbers = #tpu.dot_dimension_numbers<[1], [0], [0], [1], [0, 0, 1, 1], [], []>} : vector<8x64xf32>, vector<64x128xf32>, vector<8x128xf32> -> vector<8x128xf32>
    %c0_3 = arith.constant 0 : index
    %c0_4 = arith.constant 0 : index
    %8 = vector.load %arg4[%c0_3, %c0_4] : memref<8x128xf32, #tpu.memory_space<vmem>>, vector<8x128xf32>
    %cst_5 = arith.constant 11.3137083 : f32
    %9 = vector.broadcast %cst_5 : f32 to vector<8x128xf32>
    %10 = arith.mulf %9, %7 : vector<8x128xf32>
    %11 = arith.addf %10, %8 : vector<8x128xf32>
    %c0_6 = arith.constant 0 : index
    %c0_7 = arith.constant 0 : index
    %c0_8 = arith.constant 0 : index
    %12 = vector.load %arg2[%c0_6, %c0_7, %c0_8] : memref<1x1x8xf32, #tpu.memory_space<vmem>>, vector<1x1x8xf32>
    %c0_9 = arith.constant 0 : index
    %c0_10 = arith.constant 0 : index
    %c0_11 = arith.constant 0 : index
    %13 = vector.load %arg5[%c0_9, %c0_10, %c0_11] : memref<2x1x128xf32, #tpu.memory_space<vmem>>, vector<1x1x128xf32>
    %14 = vector.shape_cast %13 : vector<1x1x128xf32> to vector<1x128xf32>
    %c0_12 = arith.constant 0 : index
    %c0_13 = arith.constant 0 : index
    %c0_14 = arith.constant 0 : index
    %15 = vector.load %arg6[%c0_12, %c0_13, %c0_14] : memref<2x1x128xf32, #tpu.memory_space<vmem>>, vector<1x1x128xf32>
    %16 = vector.shape_cast %15 : vector<1x1x128xf32> to vector<1x128xf32>
    %cst_15 = arith.constant dense<0.000000e+00> : vector<8xf32>
    %17 = vector.multi_reduction <add>, %11, %cst_15 [1] : vector<8x128xf32> to vector<8xf32>
    %18 = vector.shape_cast %17 : vector<8xf32> to vector<8x1xf32>
    %cst_16 = arith.constant 1.280000e+02 : f32
    %19 = vector.broadcast %cst_16 : f32 to vector<8x1xf32>
    %20 = arith.divf %18, %19 : vector<8x1xf32>
    %21 = vector.broadcast %20 : vector<8x1xf32> to vector<8x128xf32>
    %22 = arith.subf %11, %21 : vector<8x128xf32>
    %23 = arith.mulf %22, %22 : vector<8x128xf32>
    %cst_17 = arith.constant dense<0.000000e+00> : vector<8xf32>
    %24 = vector.multi_reduction <add>, %23, %cst_17 [1] : vector<8x128xf32> to vector<8xf32>
    %25 = vector.shape_cast %24 : vector<8xf32> to vector<8x1xf32>
    %cst_18 = arith.constant 1.280000e+02 : f32
    %26 = vector.broadcast %cst_18 : f32 to vector<8x1xf32>
    %27 = arith.divf %25, %26 : vector<8x1xf32>
    %28 = vector.broadcast %20 : vector<8x1xf32> to vector<8x128xf32>
    %29 = arith.subf %11, %28 : vector<8x128xf32>
    %cst_19 = arith.constant 9.99999974E-6 : f32
    %30 = vector.broadcast %cst_19 : f32 to vector<8x1xf32>
    %31 = arith.addf %27, %30 : vector<8x1xf32>
    %32 = math.rsqrt %31 : vector<8x1xf32>
    %33 = vector.broadcast %32 : vector<8x1xf32> to vector<8x128xf32>
    %34 = arith.mulf %29, %33 : vector<8x128xf32>
    %35 = vector.broadcast %14 : vector<1x128xf32> to vector<8x128xf32>
    %36 = arith.mulf %34, %35 : vector<8x128xf32>
    %37 = vector.broadcast %16 : vector<1x128xf32> to vector<8x128xf32>
    %38 = arith.addf %36, %37 : vector<8x128xf32>
    %39 = arith.truncf %38 : vector<8x128xf32> to vector<8x128xbf16>
    %c0_20 = arith.constant 0 : index
    %c0_21 = arith.constant 0 : index
    %c0_22 = arith.constant 0 : index
    %40 = vector.load %arg7[%c0_20, %c0_21, %c0_22] : memref<2x128x384xbf16, #tpu.memory_space<vmem>>, vector<1x128x384xbf16>
    %41 = vector.shape_cast %40 : vector<1x128x384xbf16> to vector<128x384xbf16>
    %cst_23 = arith.constant dense<0.000000e+00> : vector<8x384xf32>
    %42 = tpu.matmul %39, %41, %cst_23 {dimension_numbers = #tpu.dot_dimension_numbers<[1], [0], [0], [1], [0, 0, 1, 1], [], []>} : vector<8x128xbf16>, vector<128x384xbf16>, vector<8x384xf32> -> vector<8x384xf32>
    %c0_24 = arith.constant 0 : index
    %c0_25 = arith.constant 0 : index
    %c0_26 = arith.constant 0 : index
    %43 = vector.load %arg8[%c0_24, %c0_25, %c0_26] : memref<2x1x384xf32, #tpu.memory_space<vmem>>, vector<1x1x384xf32>
    %44 = vector.shape_cast %43 : vector<1x1x384xf32> to vector<1x384xf32>
    %45 = vector.broadcast %44 : vector<1x384xf32> to vector<8x384xf32>
    %46 = arith.addf %42, %45 : vector<8x384xf32>
    %47 = vector.extract_strided_slice %46 {offsets = [0, 0], sizes = [8, 128], strides = [1, 1]} : vector<8x384xf32> to vector<8x128xf32>
    %48 = vector.shape_cast %47 : vector<8x128xf32> to vector<1x8x128xf32>
    %49 = vector.extract_strided_slice %46 {offsets = [0, 128], sizes = [8, 128], strides = [1, 1]} : vector<8x384xf32> to vector<8x128xf32>
    %50 = vector.shape_cast %49 : vector<8x128xf32> to vector<1x8x128xf32>
    %51 = vector.extract_strided_slice %46 {offsets = [0, 256], sizes = [8, 128], strides = [1, 1]} : vector<8x384xf32> to vector<8x128xf32>
    %52 = vector.shape_cast %51 : vector<8x128xf32> to vector<1x8x128xf32>
    %53 = arith.truncf %48 : vector<1x8x128xf32> to vector<1x8x128xbf16>
    %54 = arith.truncf %50 : vector<1x8x128xf32> to vector<1x8x128xbf16>
    "tpu.trace_start"() <{level = 10 : i32, message = "bqd,bkd->bqk"}> : () -> ()
    %cst_27 = arith.constant dense<0.000000e+00> : vector<1x8x8xf32>
    %55 = tpu.matmul %53, %54, %cst_27 {dimension_numbers = #tpu.dot_dimension_numbers<[2], [2], [1], [1], [0, 0, 0, 1, 1, 1], [0], [0]>} : vector<1x8x128xbf16>, vector<1x8x128xbf16>, vector<1x8x8xf32> -> vector<1x8x8xf32>
    "tpu.trace_stop"() : () -> ()
    %cst_28 = arith.constant 0.0883883461 : f32
    %56 = vector.broadcast %cst_28 : f32 to vector<1x8x8xf32>
    %57 = arith.mulf %55, %56 : vector<1x8x8xf32>
    %cst_29 = arith.constant 0.000000e+00 : f32
    %58 = vector.broadcast %cst_29 : f32 to vector<1x1x8xf32>
    %59 = arith.cmpf oeq, %12, %58 : vector<1x1x8xf32>
    %cst_30 = arith.constant -1.000000e+09 : f32
    %60 = vector.shape_cast %59 : vector<1x1x8xi1> to vector<1x1x8xi1>
    %61 = vector.broadcast %60 : vector<1x1x8xi1> to vector<1x8x8xi1>
    %62 = vector.broadcast %cst_30 : f32 to vector<1x8x8xf32>
    %63 = arith.select %61, %62, %57 : vector<1x8x8xi1>, vector<1x8x8xf32>
    %cst_31 = arith.constant dense<0xFF800000> : vector<1x8xf32>
    %64 = vector.multi_reduction <maximumf>, %63, %cst_31 [2] : vector<1x8x8xf32> to vector<1x8xf32>
    %65 = vector.shape_cast %64 : vector<1x8xf32> to vector<1x8x1xf32>
    %66 = vector.broadcast %65 : vector<1x8x1xf32> to vector<1x8x8xf32>
    %67 = arith.subf %63, %66 : vector<1x8x8xf32>
    %68 = math.exp %67 : vector<1x8x8xf32>
    %cst_32 = arith.constant dense<0.000000e+00> : vector<1x8xf32>
    %69 = vector.multi_reduction <add>, %68, %cst_32 [2] : vector<1x8x8xf32> to vector<1x8xf32>
    %70 = vector.shape_cast %69 : vector<1x8xf32> to vector<1x8x1xf32>
    %71 = tpu.reciprocal %70 {approx = true} : vector<1x8x1xf32> -> vector<1x8x1xf32>
    %72 = vector.broadcast %71 : vector<1x8x1xf32> to vector<1x8x8xf32>
    %73 = arith.mulf %68, %72 : vector<1x8x8xf32>
    %74 = arith.truncf %73 : vector<1x8x8xf32> to vector<1x8x8xbf16>
    %75 = arith.truncf %52 : vector<1x8x128xf32> to vector<1x8x128xbf16>
    "tpu.trace_start"() <{level = 10 : i32, message = "bqk,bkd->bqd"}> : () -> ()
    %cst_33 = arith.constant dense<0.000000e+00> : vector<1x8x128xf32>
    %76 = tpu.matmul %74, %75, %cst_33 {dimension_numbers = #tpu.dot_dimension_numbers<[2], [1], [1], [2], [0, 0, 0, 1, 1, 2], [0], [0]>} : vector<1x8x8xbf16>, vector<1x8x128xbf16>, vector<1x8x128xf32> -> vector<1x8x128xf32>
    "tpu.trace_stop"() : () -> ()
    %77 = vector.shape_cast %76 : vector<1x8x128xf32> to vector<8x128xf32>
    %78 = arith.truncf %77 : vector<8x128xf32> to vector<8x128xbf16>
    %c0_34 = arith.constant 0 : index
    %c0_35 = arith.constant 0 : index
    %c0_36 = arith.constant 0 : index
    %79 = vector.load %arg9[%c0_34, %c0_35, %c0_36] : memref<2x128x128xbf16, #tpu.memory_space<vmem>>, vector<1x128x128xbf16>
    %80 = vector.shape_cast %79 : vector<1x128x128xbf16> to vector<128x128xbf16>
    %cst_37 = arith.constant dense<0.000000e+00> : vector<8x128xf32>
    %81 = tpu.matmul %78, %80, %cst_37 {dimension_numbers = #tpu.dot_dimension_numbers<[1], [0], [0], [1], [0, 0, 1, 1], [], []>} : vector<8x128xbf16>, vector<128x128xbf16>, vector<8x128xf32> -> vector<8x128xf32>
    %c0_38 = arith.constant 0 : index
    %c0_39 = arith.constant 0 : index
    %c0_40 = arith.constant 0 : index
    %82 = vector.load %arg10[%c0_38, %c0_39, %c0_40] : memref<2x1x128xf32, #tpu.memory_space<vmem>>, vector<1x1x128xf32>
    %83 = vector.shape_cast %82 : vector<1x1x128xf32> to vector<1x128xf32>
    %84 = vector.broadcast %83 : vector<1x128xf32> to vector<8x128xf32>
    %85 = arith.addf %81, %84 : vector<8x128xf32>
    %86 = arith.addf %11, %85 : vector<8x128xf32>
    %c0_41 = arith.constant 0 : index
    %c0_42 = arith.constant 0 : index
    %c0_43 = arith.constant 0 : index
    %87 = vector.load %arg11[%c0_41, %c0_42, %c0_43] : memref<2x1x128xf32, #tpu.memory_space<vmem>>, vector<1x1x128xf32>
    %88 = vector.shape_cast %87 : vector<1x1x128xf32> to vector<1x128xf32>
    %c0_44 = arith.constant 0 : index
    %c0_45 = arith.constant 0 : index
    %c0_46 = arith.constant 0 : index
    %89 = vector.load %arg12[%c0_44, %c0_45, %c0_46] : memref<2x1x128xf32, #tpu.memory_space<vmem>>, vector<1x1x128xf32>
    %90 = vector.shape_cast %89 : vector<1x1x128xf32> to vector<1x128xf32>
    %cst_47 = arith.constant dense<0.000000e+00> : vector<8xf32>
    %91 = vector.multi_reduction <add>, %86, %cst_47 [1] : vector<8x128xf32> to vector<8xf32>
    %92 = vector.shape_cast %91 : vector<8xf32> to vector<8x1xf32>
    %cst_48 = arith.constant 1.280000e+02 : f32
    %93 = vector.broadcast %cst_48 : f32 to vector<8x1xf32>
    %94 = arith.divf %92, %93 : vector<8x1xf32>
    %95 = vector.broadcast %94 : vector<8x1xf32> to vector<8x128xf32>
    %96 = arith.subf %86, %95 : vector<8x128xf32>
    %97 = arith.mulf %96, %96 : vector<8x128xf32>
    %cst_49 = arith.constant dense<0.000000e+00> : vector<8xf32>
    %98 = vector.multi_reduction <add>, %97, %cst_49 [1] : vector<8x128xf32> to vector<8xf32>
    %99 = vector.shape_cast %98 : vector<8xf32> to vector<8x1xf32>
    %cst_50 = arith.constant 1.280000e+02 : f32
    %100 = vector.broadcast %cst_50 : f32 to vector<8x1xf32>
    %101 = arith.divf %99, %100 : vector<8x1xf32>
    %102 = vector.broadcast %94 : vector<8x1xf32> to vector<8x128xf32>
    %103 = arith.subf %86, %102 : vector<8x128xf32>
    %cst_51 = arith.constant 9.99999974E-6 : f32
    %104 = vector.broadcast %cst_51 : f32 to vector<8x1xf32>
    %105 = arith.addf %101, %104 : vector<8x1xf32>
    %106 = math.rsqrt %105 : vector<8x1xf32>
    %107 = vector.broadcast %106 : vector<8x1xf32> to vector<8x128xf32>
    %108 = arith.mulf %103, %107 : vector<8x128xf32>
    %109 = vector.broadcast %88 : vector<1x128xf32> to vector<8x128xf32>
    %110 = arith.mulf %108, %109 : vector<8x128xf32>
    %111 = vector.broadcast %90 : vector<1x128xf32> to vector<8x128xf32>
    %112 = arith.addf %110, %111 : vector<8x128xf32>
    %113 = arith.truncf %112 : vector<8x128xf32> to vector<8x128xbf16>
    %c0_52 = arith.constant 0 : index
    %c0_53 = arith.constant 0 : index
    %c0_54 = arith.constant 0 : index
    %114 = vector.load %arg13[%c0_52, %c0_53, %c0_54] : memref<2x128x256xbf16, #tpu.memory_space<vmem>>, vector<1x128x256xbf16>
    %115 = vector.shape_cast %114 : vector<1x128x256xbf16> to vector<128x256xbf16>
    %cst_55 = arith.constant dense<0.000000e+00> : vector<8x256xf32>
    %116 = tpu.matmul %113, %115, %cst_55 {dimension_numbers = #tpu.dot_dimension_numbers<[1], [0], [0], [1], [0, 0, 1, 1], [], []>} : vector<8x128xbf16>, vector<128x256xbf16>, vector<8x256xf32> -> vector<8x256xf32>
    %c0_56 = arith.constant 0 : index
    %c0_57 = arith.constant 0 : index
    %c0_58 = arith.constant 0 : index
    %117 = vector.load %arg14[%c0_56, %c0_57, %c0_58] : memref<2x1x256xf32, #tpu.memory_space<vmem>>, vector<1x1x256xf32>
    %118 = vector.shape_cast %117 : vector<1x1x256xf32> to vector<1x256xf32>
    %119 = vector.broadcast %118 : vector<1x256xf32> to vector<8x256xf32>
    %120 = arith.addf %116, %119 : vector<8x256xf32>
    %cst_59 = arith.constant 0.000000e+00 : f32
    %121 = vector.broadcast %cst_59 : f32 to vector<8x256xf32>
    %122 = arith.maximumf %120, %121 : vector<8x256xf32>
    %123 = arith.truncf %122 : vector<8x256xf32> to vector<8x256xbf16>
    %c0_60 = arith.constant 0 : index
    %c0_61 = arith.constant 0 : index
    %c0_62 = arith.constant 0 : index
    %124 = vector.load %arg15[%c0_60, %c0_61, %c0_62] : memref<2x256x128xbf16, #tpu.memory_space<vmem>>, vector<1x256x128xbf16>
    %125 = vector.shape_cast %124 : vector<1x256x128xbf16> to vector<256x128xbf16>
    %cst_63 = arith.constant dense<0.000000e+00> : vector<8x128xf32>
    %126 = tpu.matmul %123, %125, %cst_63 {dimension_numbers = #tpu.dot_dimension_numbers<[1], [0], [0], [1], [0, 0, 1, 1], [], []>} : vector<8x256xbf16>, vector<256x128xbf16>, vector<8x128xf32> -> vector<8x128xf32>
    %c0_64 = arith.constant 0 : index
    %c0_65 = arith.constant 0 : index
    %c0_66 = arith.constant 0 : index
    %127 = vector.load %arg16[%c0_64, %c0_65, %c0_66] : memref<2x1x128xf32, #tpu.memory_space<vmem>>, vector<1x1x128xf32>
    %128 = vector.shape_cast %127 : vector<1x1x128xf32> to vector<1x128xf32>
    %129 = vector.broadcast %128 : vector<1x128xf32> to vector<8x128xf32>
    %130 = arith.addf %126, %129 : vector<8x128xf32>
    %131 = arith.addf %86, %130 : vector<8x128xf32>
    %c0_67 = arith.constant 0 : index
    %c0_68 = arith.constant 0 : index
    %c0_69 = arith.constant 0 : index
    %132 = vector.load %arg20[%c0_67, %c0_68, %c0_69] : memref<1x8x8xf32, #tpu.memory_space<vmem>>, vector<1x8x8xf32>
    tpu.vector_store %arg20[%c0_67, %c0_68, %c0_69], %73 {strides = array<i32>} : memref<1x8x8xf32, #tpu.memory_space<vmem>>, vector<1x8x8xf32>,
    %c1 = arith.constant 1 : index
    %c0_70 = arith.constant 0 : index
    %c0_71 = arith.constant 0 : index
    %133 = vector.load %arg5[%c1, %c0_70, %c0_71] : memref<2x1x128xf32, #tpu.memory_space<vmem>>, vector<1x1x128xf32>
    %134 = vector.shape_cast %133 : vector<1x1x128xf32> to vector<1x128xf32>
    %c1_72 = arith.constant 1 : index
    %c0_73 = arith.constant 0 : index
    %c0_74 = arith.constant 0 : index
    %135 = vector.load %arg6[%c1_72, %c0_73, %c0_74] : memref<2x1x128xf32, #tpu.memory_space<vmem>>, vector<1x1x128xf32>
    %136 = vector.shape_cast %135 : vector<1x1x128xf32> to vector<1x128xf32>
    %cst_75 = arith.constant dense<0.000000e+00> : vector<8xf32>
    %137 = vector.multi_reduction <add>, %131, %cst_75 [1] : vector<8x128xf32> to vector<8xf32>
    %138 = vector.shape_cast %137 : vector<8xf32> to vector<8x1xf32>
    %cst_76 = arith.constant 1.280000e+02 : f32
    %139 = vector.broadcast %cst_76 : f32 to vector<8x1xf32>
    %140 = arith.divf %138, %139 : vector<8x1xf32>
    %141 = vector.broadcast %140 : vector<8x1xf32> to vector<8x128xf32>
    %142 = arith.subf %131, %141 : vector<8x128xf32>
    %143 = arith.mulf %142, %142 : vector<8x128xf32>
    %cst_77 = arith.constant dense<0.000000e+00> : vector<8xf32>
    %144 = vector.multi_reduction <add>, %143, %cst_77 [1] : vector<8x128xf32> to vector<8xf32>
    %145 = vector.shape_cast %144 : vector<8xf32> to vector<8x1xf32>
    %cst_78 = arith.constant 1.280000e+02 : f32
    %146 = vector.broadcast %cst_78 : f32 to vector<8x1xf32>
    %147 = arith.divf %145, %146 : vector<8x1xf32>
    %148 = vector.broadcast %140 : vector<8x1xf32> to vector<8x128xf32>
    %149 = arith.subf %131, %148 : vector<8x128xf32>
    %cst_79 = arith.constant 9.99999974E-6 : f32
    %150 = vector.broadcast %cst_79 : f32 to vector<8x1xf32>
    %151 = arith.addf %147, %150 : vector<8x1xf32>
    %152 = math.rsqrt %151 : vector<8x1xf32>
    %153 = vector.broadcast %152 : vector<8x1xf32> to vector<8x128xf32>
    %154 = arith.mulf %149, %153 : vector<8x128xf32>
    %155 = vector.broadcast %134 : vector<1x128xf32> to vector<8x128xf32>
    %156 = arith.mulf %154, %155 : vector<8x128xf32>
    %157 = vector.broadcast %136 : vector<1x128xf32> to vector<8x128xf32>
    %158 = arith.addf %156, %157 : vector<8x128xf32>
    %159 = arith.truncf %158 : vector<8x128xf32> to vector<8x128xbf16>
    %c1_80 = arith.constant 1 : index
    %c0_81 = arith.constant 0 : index
    %c0_82 = arith.constant 0 : index
    %160 = vector.load %arg7[%c1_80, %c0_81, %c0_82] : memref<2x128x384xbf16, #tpu.memory_space<vmem>>, vector<1x128x384xbf16>
    %161 = vector.shape_cast %160 : vector<1x128x384xbf16> to vector<128x384xbf16>
    %cst_83 = arith.constant dense<0.000000e+00> : vector<8x384xf32>
    %162 = tpu.matmul %159, %161, %cst_83 {dimension_numbers = #tpu.dot_dimension_numbers<[1], [0], [0], [1], [0, 0, 1, 1], [], []>} : vector<8x128xbf16>, vector<128x384xbf16>, vector<8x384xf32> -> vector<8x384xf32>
    %c1_84 = arith.constant 1 : index
    %c0_85 = arith.constant 0 : index
    %c0_86 = arith.constant 0 : index
    %163 = vector.load %arg8[%c1_84, %c0_85, %c0_86] : memref<2x1x384xf32, #tpu.memory_space<vmem>>, vector<1x1x384xf32>
    %164 = vector.shape_cast %163 : vector<1x1x384xf32> to vector<1x384xf32>
    %165 = vector.broadcast %164 : vector<1x384xf32> to vector<8x384xf32>
    %166 = arith.addf %162, %165 : vector<8x384xf32>
    %167 = vector.extract_strided_slice %166 {offsets = [0, 0], sizes = [8, 128], strides = [1, 1]} : vector<8x384xf32> to vector<8x128xf32>
    %168 = vector.shape_cast %167 : vector<8x128xf32> to vector<1x8x128xf32>
    %169 = vector.extract_strided_slice %166 {offsets = [0, 128], sizes = [8, 128], strides = [1, 1]} : vector<8x384xf32> to vector<8x128xf32>
    %170 = vector.shape_cast %169 : vector<8x128xf32> to vector<1x8x128xf32>
    %171 = vector.extract_strided_slice %166 {offsets = [0, 256], sizes = [8, 128], strides = [1, 1]} : vector<8x384xf32> to vector<8x128xf32>
    %172 = vector.shape_cast %171 : vector<8x128xf32> to vector<1x8x128xf32>
    %173 = arith.truncf %168 : vector<1x8x128xf32> to vector<1x8x128xbf16>
    %174 = arith.truncf %170 : vector<1x8x128xf32> to vector<1x8x128xbf16>
    "tpu.trace_start"() <{level = 10 : i32, message = "bqd,bkd->bqk"}> : () -> ()
    %cst_87 = arith.constant dense<0.000000e+00> : vector<1x8x8xf32>
    %175 = tpu.matmul %173, %174, %cst_87 {dimension_numbers = #tpu.dot_dimension_numbers<[2], [2], [1], [1], [0, 0, 0, 1, 1, 1], [0], [0]>} : vector<1x8x128xbf16>, vector<1x8x128xbf16>, vector<1x8x8xf32> -> vector<1x8x8xf32>
    "tpu.trace_stop"() : () -> ()
    %cst_88 = arith.constant 0.0883883461 : f32
    %176 = vector.broadcast %cst_88 : f32 to vector<1x8x8xf32>
    %177 = arith.mulf %175, %176 : vector<1x8x8xf32>
    %cst_89 = arith.constant 0.000000e+00 : f32
    %178 = vector.broadcast %cst_89 : f32 to vector<1x1x8xf32>
    %179 = arith.cmpf oeq, %12, %178 : vector<1x1x8xf32>
    %cst_90 = arith.constant -1.000000e+09 : f32
    %180 = vector.shape_cast %179 : vector<1x1x8xi1> to vector<1x1x8xi1>
    %181 = vector.broadcast %180 : vector<1x1x8xi1> to vector<1x8x8xi1>
    %182 = vector.broadcast %cst_90 : f32 to vector<1x8x8xf32>
    %183 = arith.select %181, %182, %177 : vector<1x8x8xi1>, vector<1x8x8xf32>
    %cst_91 = arith.constant dense<0xFF800000> : vector<1x8xf32>
    %184 = vector.multi_reduction <maximumf>, %183, %cst_91 [2] : vector<1x8x8xf32> to vector<1x8xf32>
    %185 = vector.shape_cast %184 : vector<1x8xf32> to vector<1x8x1xf32>
    %186 = vector.broadcast %185 : vector<1x8x1xf32> to vector<1x8x8xf32>
    %187 = arith.subf %183, %186 : vector<1x8x8xf32>
    %188 = math.exp %187 : vector<1x8x8xf32>
    %cst_92 = arith.constant dense<0.000000e+00> : vector<1x8xf32>
    %189 = vector.multi_reduction <add>, %188, %cst_92 [2] : vector<1x8x8xf32> to vector<1x8xf32>
    %190 = vector.shape_cast %189 : vector<1x8xf32> to vector<1x8x1xf32>
    %191 = tpu.reciprocal %190 {approx = true} : vector<1x8x1xf32> -> vector<1x8x1xf32>
    %192 = vector.broadcast %191 : vector<1x8x1xf32> to vector<1x8x8xf32>
    %193 = arith.mulf %188, %192 : vector<1x8x8xf32>
    %194 = arith.truncf %193 : vector<1x8x8xf32> to vector<1x8x8xbf16>
    %195 = arith.truncf %172 : vector<1x8x128xf32> to vector<1x8x128xbf16>
    "tpu.trace_start"() <{level = 10 : i32, message = "bqk,bkd->bqd"}> : () -> ()
    %cst_93 = arith.constant dense<0.000000e+00> : vector<1x8x128xf32>
    %196 = tpu.matmul %194, %195, %cst_93 {dimension_numbers = #tpu.dot_dimension_numbers<[2], [1], [1], [2], [0, 0, 0, 1, 1, 2], [0], [0]>} : vector<1x8x8xbf16>, vector<1x8x128xbf16>, vector<1x8x128xf32> -> vector<1x8x128xf32>
    "tpu.trace_stop"() : () -> ()
    %197 = vector.shape_cast %196 : vector<1x8x128xf32> to vector<8x128xf32>
    %198 = arith.truncf %197 : vector<8x128xf32> to vector<8x128xbf16>
    %c1_94 = arith.constant 1 : index
    %c0_95 = arith.constant 0 : index
    %c0_96 = arith.constant 0 : index
    %199 = vector.load %arg9[%c1_94, %c0_95, %c0_96] : memref<2x128x128xbf16, #tpu.memory_space<vmem>>, vector<1x128x128xbf16>
    %200 = vector.shape_cast %199 : vector<1x128x128xbf16> to vector<128x128xbf16>
    %cst_97 = arith.constant dense<0.000000e+00> : vector<8x128xf32>
    %201 = tpu.matmul %198, %200, %cst_97 {dimension_numbers = #tpu.dot_dimension_numbers<[1], [0], [0], [1], [0, 0, 1, 1], [], []>} : vector<8x128xbf16>, vector<128x128xbf16>, vector<8x128xf32> -> vector<8x128xf32>
    %c1_98 = arith.constant 1 : index
    %c0_99 = arith.constant 0 : index
    %c0_100 = arith.constant 0 : index
    %202 = vector.load %arg10[%c1_98, %c0_99, %c0_100] : memref<2x1x128xf32, #tpu.memory_space<vmem>>, vector<1x1x128xf32>
    %203 = vector.shape_cast %202 : vector<1x1x128xf32> to vector<1x128xf32>
    %204 = vector.broadcast %203 : vector<1x128xf32> to vector<8x128xf32>
    %205 = arith.addf %201, %204 : vector<8x128xf32>
    %206 = arith.addf %131, %205 : vector<8x128xf32>
    %c1_101 = arith.constant 1 : index
    %c0_102 = arith.constant 0 : index
    %c0_103 = arith.constant 0 : index
    %207 = vector.load %arg11[%c1_101, %c0_102, %c0_103] : memref<2x1x128xf32, #tpu.memory_space<vmem>>, vector<1x1x128xf32>
    %208 = vector.shape_cast %207 : vector<1x1x128xf32> to vector<1x128xf32>
    %c1_104 = arith.constant 1 : index
    %c0_105 = arith.constant 0 : index
    %c0_106 = arith.constant 0 : index
    %209 = vector.load %arg12[%c1_104, %c0_105, %c0_106] : memref<2x1x128xf32, #tpu.memory_space<vmem>>, vector<1x1x128xf32>
    %210 = vector.shape_cast %209 : vector<1x1x128xf32> to vector<1x128xf32>
    %cst_107 = arith.constant dense<0.000000e+00> : vector<8xf32>
    %211 = vector.multi_reduction <add>, %206, %cst_107 [1] : vector<8x128xf32> to vector<8xf32>
    %212 = vector.shape_cast %211 : vector<8xf32> to vector<8x1xf32>
    %cst_108 = arith.constant 1.280000e+02 : f32
    %213 = vector.broadcast %cst_108 : f32 to vector<8x1xf32>
    %214 = arith.divf %212, %213 : vector<8x1xf32>
    %215 = vector.broadcast %214 : vector<8x1xf32> to vector<8x128xf32>
    %216 = arith.subf %206, %215 : vector<8x128xf32>
    %217 = arith.mulf %216, %216 : vector<8x128xf32>
    %cst_109 = arith.constant dense<0.000000e+00> : vector<8xf32>
    %218 = vector.multi_reduction <add>, %217, %cst_109 [1] : vector<8x128xf32> to vector<8xf32>
    %219 = vector.shape_cast %218 : vector<8xf32> to vector<8x1xf32>
    %cst_110 = arith.constant 1.280000e+02 : f32
    %220 = vector.broadcast %cst_110 : f32 to vector<8x1xf32>
    %221 = arith.divf %219, %220 : vector<8x1xf32>
    %222 = vector.broadcast %214 : vector<8x1xf32> to vector<8x128xf32>
    %223 = arith.subf %206, %222 : vector<8x128xf32>
    %cst_111 = arith.constant 9.99999974E-6 : f32
    %224 = vector.broadcast %cst_111 : f32 to vector<8x1xf32>
    %225 = arith.addf %221, %224 : vector<8x1xf32>
    %226 = math.rsqrt %225 : vector<8x1xf32>
    %227 = vector.broadcast %226 : vector<8x1xf32> to vector<8x128xf32>
    %228 = arith.mulf %223, %227 : vector<8x128xf32>
    %229 = vector.broadcast %208 : vector<1x128xf32> to vector<8x128xf32>
    %230 = arith.mulf %228, %229 : vector<8x128xf32>
    %231 = vector.broadcast %210 : vector<1x128xf32> to vector<8x128xf32>
    %232 = arith.addf %230, %231 : vector<8x128xf32>
    %233 = arith.truncf %232 : vector<8x128xf32> to vector<8x128xbf16>
    %c1_112 = arith.constant 1 : index
    %c0_113 = arith.constant 0 : index
    %c0_114 = arith.constant 0 : index
    %234 = vector.load %arg13[%c1_112, %c0_113, %c0_114] : memref<2x128x256xbf16, #tpu.memory_space<vmem>>, vector<1x128x256xbf16>
    %235 = vector.shape_cast %234 : vector<1x128x256xbf16> to vector<128x256xbf16>
    %cst_115 = arith.constant dense<0.000000e+00> : vector<8x256xf32>
    %236 = tpu.matmul %233, %235, %cst_115 {dimension_numbers = #tpu.dot_dimension_numbers<[1], [0], [0], [1], [0, 0, 1, 1], [], []>} : vector<8x128xbf16>, vector<128x256xbf16>, vector<8x256xf32> -> vector<8x256xf32>
    %c1_116 = arith.constant 1 : index
    %c0_117 = arith.constant 0 : index
    %c0_118 = arith.constant 0 : index
    %237 = vector.load %arg14[%c1_116, %c0_117, %c0_118] : memref<2x1x256xf32, #tpu.memory_space<vmem>>, vector<1x1x256xf32>
    %238 = vector.shape_cast %237 : vector<1x1x256xf32> to vector<1x256xf32>
    %239 = vector.broadcast %238 : vector<1x256xf32> to vector<8x256xf32>
    %240 = arith.addf %236, %239 : vector<8x256xf32>
    %cst_119 = arith.constant 0.000000e+00 : f32
    %241 = vector.broadcast %cst_119 : f32 to vector<8x256xf32>
    %242 = arith.maximumf %240, %241 : vector<8x256xf32>
    %243 = arith.truncf %242 : vector<8x256xf32> to vector<8x256xbf16>
    %c1_120 = arith.constant 1 : index
    %c0_121 = arith.constant 0 : index
    %c0_122 = arith.constant 0 : index
    %244 = vector.load %arg15[%c1_120, %c0_121, %c0_122] : memref<2x256x128xbf16, #tpu.memory_space<vmem>>, vector<1x256x128xbf16>
    %245 = vector.shape_cast %244 : vector<1x256x128xbf16> to vector<256x128xbf16>
    %cst_123 = arith.constant dense<0.000000e+00> : vector<8x128xf32>
    %246 = tpu.matmul %243, %245, %cst_123 {dimension_numbers = #tpu.dot_dimension_numbers<[1], [0], [0], [1], [0, 0, 1, 1], [], []>} : vector<8x256xbf16>, vector<256x128xbf16>, vector<8x128xf32> -> vector<8x128xf32>
    %c1_124 = arith.constant 1 : index
    %c0_125 = arith.constant 0 : index
    %c0_126 = arith.constant 0 : index
    %247 = vector.load %arg16[%c1_124, %c0_125, %c0_126] : memref<2x1x128xf32, #tpu.memory_space<vmem>>, vector<1x1x128xf32>
    %248 = vector.shape_cast %247 : vector<1x1x128xf32> to vector<1x128xf32>
    %249 = vector.broadcast %248 : vector<1x128xf32> to vector<8x128xf32>
    %250 = arith.addf %246, %249 : vector<8x128xf32>
    %251 = arith.addf %206, %250 : vector<8x128xf32>
    %c0_127 = arith.constant 0 : index
    %c0_128 = arith.constant 0 : index
    %c0_129 = arith.constant 0 : index
    %252 = vector.load %arg21[%c0_127, %c0_128, %c0_129] : memref<1x8x8xf32, #tpu.memory_space<vmem>>, vector<1x8x8xf32>
    tpu.vector_store %arg21[%c0_127, %c0_128, %c0_129], %193 {strides = array<i32>} : memref<1x8x8xf32, #tpu.memory_space<vmem>>, vector<1x8x8xf32>,
    %253 = vector.extract_strided_slice %251 {offsets = [0, 0], sizes = [1, 128], strides = [1, 1]} : vector<8x128xf32> to vector<1x128xf32>
    %c0_130 = arith.constant 0 : index
    %c0_131 = arith.constant 0 : index
    %254 = vector.load %arg17[%c0_130, %c0_131] : memref<128x128xf32, #tpu.memory_space<vmem>>, vector<128x128xf32>
    %cst_132 = arith.constant dense<0.000000e+00> : vector<1x128xf32>
    %255 = tpu.matmul %253, %254, %cst_132 {dimension_numbers = #tpu.dot_dimension_numbers<[1], [0], [0], [1], [0, 0, 1, 1], [], []>} : vector<1x128xf32>, vector<128x128xf32>, vector<1x128xf32> -> vector<1x128xf32>
    %c0_133 = arith.constant 0 : index
    %c0_134 = arith.constant 0 : index
    %256 = vector.load %arg18[%c0_133, %c0_134] : memref<1x128xf32, #tpu.memory_space<vmem>>, vector<1x128xf32>
    %257 = arith.addf %255, %256 : vector<1x128xf32>
    %258 = vector.shape_cast %257 : vector<1x128xf32> to vector<1x1x128xf32>
    %c0_135 = arith.constant 0 : index
    %c0_136 = arith.constant 0 : index
    %c0_137 = arith.constant 0 : index
    %259 = vector.load %arg19[%c0_135, %c0_136, %c0_137] : memref<1x1x128xf32, #tpu.memory_space<vmem>>, vector<1x1x128xf32>
    tpu.vector_store %arg19[%c0_135, %c0_136, %c0_137], %258 {strides = array<i32>} : memref<1x1x128xf32, #tpu.memory_space<vmem>>, vector<1x1x128xf32>,
    return
  }
  func.func @transform_0(%arg0: i32) -> (i32, i32) {
    %c0_i32 = arith.constant 0 : i32
    %c0_i32_0 = arith.constant 0 : i32
    return %arg0, %c0_i32 : i32, i32
  }
  func.func @transform_1(%arg0: i32) -> (i32, i32, i32) {
    %c0_i32 = arith.constant 0 : i32
    %c0_i32_0 = arith.constant 0 : i32
    %c0_i32_1 = arith.constant 0 : i32
    return %arg0, %c0_i32, %c0_i32_0 : i32, i32, i32
  }
  func.func @transform_2(%arg0: i32) -> (i32, i32) {
    %c0_i32 = arith.constant 0 : i32
    %c0_i32_0 = arith.constant 0 : i32
    %c0_i32_1 = arith.constant 0 : i32
    return %c0_i32, %c0_i32_0 : i32, i32
  }
  func.func @transform_3(%arg0: i32) -> (i32, i32) {
    %c0_i32 = arith.constant 0 : i32
    %c0_i32_0 = arith.constant 0 : i32
    %c0_i32_1 = arith.constant 0 : i32
    return %c0_i32, %c0_i32_0 : i32, i32
  }
  func.func @transform_4(%arg0: i32) -> (i32, i32, i32) {
    %c0_i32 = arith.constant 0 : i32
    %c0_i32_0 = arith.constant 0 : i32
    %c0_i32_1 = arith.constant 0 : i32
    %c0_i32_2 = arith.constant 0 : i32
    return %c0_i32, %c0_i32_0, %c0_i32_1 : i32, i32, i32
  }
  func.func @transform_5(%arg0: i32) -> (i32, i32, i32) {
    %c0_i32 = arith.constant 0 : i32
    %c0_i32_0 = arith.constant 0 : i32
    %c0_i32_1 = arith.constant 0 : i32
    %c0_i32_2 = arith.constant 0 : i32
    return %c0_i32, %c0_i32_0, %c0_i32_1 : i32, i32, i32
  }
  func.func @transform_6(%arg0: i32) -> (i32, i32, i32) {
    %c0_i32 = arith.constant 0 : i32
    %c0_i32_0 = arith.constant 0 : i32
    %c0_i32_1 = arith.constant 0 : i32
    %c0_i32_2 = arith.constant 0 : i32
    return %c0_i32, %c0_i32_0, %c0_i32_1 : i32, i32, i32
  }
  func.func @transform_7(%arg0: i32) -> (i32, i32, i32) {
    %c0_i32 = arith.constant 0 : i32
    %c0_i32_0 = arith.constant 0 : i32
    %c0_i32_1 = arith.constant 0 : i32
    %c0_i32_2 = arith.constant 0 : i32
    return %c0_i32, %c0_i32_0, %c0_i32_1 : i32, i32, i32
  }
  func.func @transform_8(%arg0: i32) -> (i32, i32, i32) {
    %c0_i32 = arith.constant 0 : i32
    %c0_i32_0 = arith.constant 0 : i32
    %c0_i32_1 = arith.constant 0 : i32
    %c0_i32_2 = arith.constant 0 : i32
    return %c0_i32, %c0_i32_0, %c0_i32_1 : i32, i32, i32
  }
  func.func @transform_9(%arg0: i32) -> (i32, i32, i32) {
    %c0_i32 = arith.constant 0 : i32
    %c0_i32_0 = arith.constant 0 : i32
    %c0_i32_1 = arith.constant 0 : i32
    %c0_i32_2 = arith.constant 0 : i32
    return %c0_i32, %c0_i32_0, %c0_i32_1 : i32, i32, i32
  }
  func.func @transform_10(%arg0: i32) -> (i32, i32, i32) {
    %c0_i32 = arith.constant 0 : i32
    %c0_i32_0 = arith.constant 0 : i32
    %c0_i32_1 = arith.constant 0 : i32
    %c0_i32_2 = arith.constant 0 : i32
    return %c0_i32, %c0_i32_0, %c0_i32_1 : i32, i32, i32
  }
  func.func @transform_11(%arg0: i32) -> (i32, i32, i32) {
    %c0_i32 = arith.constant 0 : i32
    %c0_i32_0 = arith.constant 0 : i32
    %c0_i32_1 = arith.constant 0 : i32
    %c0_i32_2 = arith.constant 0 : i32
    return %c0_i32, %c0_i32_0, %c0_i32_1 : i32, i32, i32
  }
  func.func @transform_12(%arg0: i32) -> (i32, i32, i32) {
    %c0_i32 = arith.constant 0 : i32
    %c0_i32_0 = arith.constant 0 : i32
    %c0_i32_1 = arith.constant 0 : i32
    %c0_i32_2 = arith.constant 0 : i32
    return %c0_i32, %c0_i32_0, %c0_i32_1 : i32, i32, i32
  }
  func.func @transform_13(%arg0: i32) -> (i32, i32, i32) {
    %c0_i32 = arith.constant 0 : i32
    %c0_i32_0 = arith.constant 0 : i32
    %c0_i32_1 = arith.constant 0 : i32
    %c0_i32_2 = arith.constant 0 : i32
    return %c0_i32, %c0_i32_0, %c0_i32_1 : i32, i32, i32
  }
  func.func @transform_14(%arg0: i32) -> (i32, i32, i32) {
    %c0_i32 = arith.constant 0 : i32
    %c0_i32_0 = arith.constant 0 : i32
    %c0_i32_1 = arith.constant 0 : i32
    %c0_i32_2 = arith.constant 0 : i32
    return %c0_i32, %c0_i32_0, %c0_i32_1 : i32, i32, i32
  }
  func.func @transform_15(%arg0: i32) -> (i32, i32, i32) {
    %c0_i32 = arith.constant 0 : i32
    %c0_i32_0 = arith.constant 0 : i32
    %c0_i32_1 = arith.constant 0 : i32
    %c0_i32_2 = arith.constant 0 : i32
    return %c0_i32, %c0_i32_0, %c0_i32_1 : i32, i32, i32
  }
  func.func @transform_16(%arg0: i32) -> (i32, i32) {
    %c0_i32 = arith.constant 0 : i32
    %c0_i32_0 = arith.constant 0 : i32
    %c0_i32_1 = arith.constant 0 : i32
    return %c0_i32, %c0_i32_0 : i32, i32
  }
  func.func @transform_17(%arg0: i32) -> (i32, i32) {
    %c0_i32 = arith.constant 0 : i32
    %c0_i32_0 = arith.constant 0 : i32
    %c0_i32_1 = arith.constant 0 : i32
    return %c0_i32, %c0_i32_0 : i32, i32
  }
  func.func @transform_18(%arg0: i32) -> (i32, i32, i32) {
    %c0_i32 = arith.constant 0 : i32
    %c0_i32_0 = arith.constant 0 : i32
    %c0_i32_1 = arith.constant 0 : i32
    return %arg0, %c0_i32, %c0_i32_0 : i32, i32, i32
  }
  func.func @transform_19(%arg0: i32) -> (i32, i32, i32) {
    %c0_i32 = arith.constant 0 : i32
    %c0_i32_0 = arith.constant 0 : i32
    %c0_i32_1 = arith.constant 0 : i32
    return %arg0, %c0_i32, %c0_i32_0 : i32, i32, i32
  }
  func.func @transform_20(%arg0: i32) -> (i32, i32, i32) {
    %c0_i32 = arith.constant 0 : i32
    %c0_i32_0 = arith.constant 0 : i32
    %c0_i32_1 = arith.constant 0 : i32
    return %arg0, %c0_i32, %c0_i32_0 : i32, i32, i32
  }
}

</mosaic_0001>

<bundles_post_ra>
// kernel: tpu_custom_call.1
= control target key start
LH: loop header
LB: loop body
LE: loop exit
PB: predicated region body
PF: predicated region fallthrough
CT: control target
= control target key end

     0   :  { %s4653_s0 = inlined_call_operand.vmem [shape: s32[16,1], index: 0, kind: input, shape index: {}]   ;;  %s4654_s1 = inlined_call_operand.vmem [shape: f32[2,1,8], index: 1, kind: input, shape index: {}]   ;;  %s4655_s2 = inlined_call_operand.hbm [shape: f32[64,128], index: 2, kind: input, shape index: {}]   ;;  %s4656_s3 = inlined_call_operand.vmem [shape: f32[8,128], index: 3, kind: input, shape index: {}]   ;;  %s4657_s4 = inlined_call_operand.vmem [shape: f32[2,1,128], index: 4, kind: input, shape index: {}]   ;;  %s4658_s5 = inlined_call_operand.vmem [shape: f32[2,1,128], index: 5, kind: input, shape index: {}]   ;;  %s4659_s6 = inlined_call_operand.hbm [shape: bf16[2,128,384], index: 6, kind: input, shape index: {}]   ;;  %s4660_s7 = inlined_call_operand.vmem [shape: f32[2,1,384], index: 7, kind: input, shape index: {}]   ;;  %s4661_s8 = inlined_call_operand.hbm [shape: bf16[2,128,128], index: 8, kind: input, shape index: {}]   ;;  %s4662_s9 = inlined_call_operand.vmem [shape: f32[2,1,128], index: 9, kind: input, shape index: {}]   ;;  %s4663_s10 = inlined_call_operand.vmem [shape: f32[2,1,128], index: 10, kind: input, shape index: {}]   ;;  %s4664_s11 = inlined_call_operand.vmem [shape: f32[2,1,128], index: 11, kind: input, shape index: {}]   ;;  %s4665_s12 = inlined_call_operand.hbm [shape: bf16[2,128,256], index: 12, kind: input, shape index: {}]   ;;  %s4666_s13 = inlined_call_operand.vmem [shape: f32[2,1,256], index: 13, kind: input, shape index: {}]   ;;  %s4667_s14 = inlined_call_operand.hbm [shape: bf16[2,256,128], index: 14, kind: input, shape index: {}]   ;;  %s4668_s15 = inlined_call_operand.vmem [shape: f32[2,1,128], index: 15, kind: input, shape index: {}]   ;;  %s4669_s16 = inlined_call_operand.hbm [shape: f32[128,128], index: 16, kind: input, shape index: {}]   ;;  %s4670_s17 = inlined_call_operand.vmem [shape: f32[1,128], index: 17, kind: input, shape index: {}]   ;;  %s4671_s18 = inlined_call_operand.hbm [shape: f32[2,1,128], index: 18, kind: output, shape index: {0}]   ;;  %s4672_s19 = inlined_call_operand.hbm [shape: f32[2,8,8], index: 19, kind: output, shape index: {1}]   ;;  %s4673_s20 = inlined_call_operand.hbm [shape: f32[2,8,8], index: 20, kind: output, shape index: {2}]  }
   0x1   :  { %4696 = sst [smem:[#allocation30_spill]] %s4653_s0 }
   0x2   :  { %4697 = sst [smem:[#allocation31_spill]] %s4654_s1 }
   0x3   :  { %4698 = sst [smem:[#allocation32_spill]] %s4655_s2 }
   0x4   :  { %4699 = sst [smem:[#allocation33_spill]] %s4656_s3 }
   0x5   :  { %4700 = sst [smem:[#allocation34_spill]] %s4657_s4 }
   0x6   :  { %4701 = sst [smem:[#allocation35_spill]] %s4658_s5 }
   0x7   :  { %4702 = sst [smem:[#allocation36_spill]] %s4659_s6 }
   0x8   :  { %4703 = sst [smem:[#allocation37_spill]] %s4668_s15 }
   0x9   :  { %4704 = sst [smem:[#allocation38_spill]] %s4670_s17 }
   0xa   :  { %4705 = sst [smem:[#allocation39_spill]] %s4671_s18 }
   0xb   :  { %4706 = sst [smem:[#allocation40_spill]] %s4672_s19 }
   0xc   :  { %4707 = sst [smem:[#allocation41_spill]] %s4673_s20 }
   0xd   :  { %26 = vsyncpa [#allocation3], 0 }
   0xe   :  { %27 = vsyncpa [#allocation6], 0 }
   0xf   :  { %28 = vsyncpa [#allocation9], 0 }
  0x10   :  { %29 = vsyncpa [#allocation12], 0 }
  0x11   :  { %30 = vsyncpa [#allocation4], 0 }
  0x12   :  { %32 = vsyncpa [#allocation4 + $0x1], 0 }
  0x13   :  { %33 = vsyncpa [#allocation15], 0 }
  0x14   :  { %35 = vsyncpa [#allocation15 + $0x1], 0  ;;  %s4119_s1 = smov 0   ;;  %s4121_s22 = smov 0  }
  0x15   :  { %s4123_s23 = smov 0   ;;  %s4125_s24 = smov 0  }
  0x16 LB: > { %4708 = sst [smem:[#allocation23_spill]] %s3981_s1  ;;  %s4140_s2 = sadd.s32 4294967295, %s3993_s24   ;;  %s3993_s24 = sphi %s4125_s24, %s4754_s24   ;;  %s3989_s23 = sphi %s4123_s23, %s4756_s23   ;;  %s3985_s22 = sphi %s4121_s22, %s4758_s22   ;;  %s3981_s1 = sphi %s4119_s1, %s4757_s1  }
  0x17   : > { %4709 = sst [smem:[#allocation24_spill]] %s3989_s23  ;;  %s4676_s25 = sadd.s32 4294967294, %s3993_s24  }
  0x18   : > { %4710 = sst [smem:[#allocation25_spill]] %s3993_s24  ;;  %s4144_s3 = sadd.s32 1, %s3993_s24  }
  0x19   : > { %4711 = sst [smem:[#allocation26_spill]] %s4144_s3  ;;  %s436_s26 = sadd.s32 1, %s3989_s23 }
  0x1a   : > { %s433_s27 = ssub.s32 %s3993_s24, %s4144_s3  ;;  %p446_p0 = scmp.ne.s32.totalorder %s3989_s23, %s3985_s22 }
  0x1b   : > { %p434_p1 = scmp.eq.s32.totalorder %s433_s27, 0  ;;  %p447_p2 = scmp.eq.s32.totalorder %s4140_s2, 1 }
  0x1c   : > { %p452_p3 = scmp.ne.s32.totalorder %s3985_s22, %s3981_s1  ;;  %p453_p4 = scmp.eq.s32.totalorder %s4676_s25, 1 }
  0x1d   : > { %s4157_s28 = scalar_select %p434_p1, %s3989_s23, %s436_s26  }
  0x1e   : > { %p4159_p5 = por %p447_p2, %p446_p0  ;;  %p4163_p6 = por %p453_p4, %p452_p3 }
  0x1f   : > { %4712 = sst [smem:[#allocation27_spill]] %s4157_s28  ;;  %p2905_p7 = scmp.ge.s32.totalorder %s3993_s24, 1 }
  0x20   : > { %s4713_s4 = scalar_select %p4159_p5, 1, 0 }
  0x21   : > { %s4715_s29 = scalar_select %p4163_p6, 1, 0 }
  0x22   : > { %4714 = sst [smem:[#allocation28_spill]] %s4713_s4  ;;  %p512_p8 = scmp.lt.s32.totalorder %s3993_s24, 3 }
  0x23   : > { %4716 = sst [smem:[#allocation29_spill]] %s4715_s29  ;;  %p4685_p9 = scmp.eq.s32.totalorder %s4140_s2, 0 }
  0x24   : > { %p4170_p10 = pnand %p2905_p7, %p512_p8  ;;  %s3995_s0 = smov [#allocation5]  }
  0x25   : > { %s546_s21 = sshll.u32 %s3995_s0, 4  ;;  %s3996_s27 = smov [#allocation8]   ;;  %s547_s21 = int_to_ptr.vmem [resolvable:$true] %s546_s21 }
  0x26   : > { %s4717_s30 = scalar_select %p4170_p10, 1, 0 }
  0x27   : > { %p3420_p11 = pneg %p4170_p10  ;;  %s584_s25 = sshll.u32 %s3996_s27, 4  ;;  %s585_s25 = int_to_ptr.vmem [resolvable:$true] %s584_s25 }
  0x28   : > { %s4719_s6 = sld [smem:[#allocation36_spill]] }
  0x29   : > { %p4178_p12 = pnand %p4685_p9, %p3420_p11 }
  0x2b   : > { %p4190_p0 = pneg %p4178_p12 }
  0x2e   : > { %s3687_s3 = scalar_lea.hbm %s4719_s6, 6144 }
  0x2f   : > { %p3688_p13 = scmp.ne.s32.totalorder %s4719_s6, %s3687_s3  ;;  %p3694_p3 = scmp.lt.u32.totalorder %s3687_s3, %s4719_s6 }
  0x31   : > { %p3690_p1 = pnand %p4190_p0, %p3688_p13 }
  0x33   : > { %p3691_p2 = pneg %p3690_p1 }
  0x35   : > { %p3696_p4 = pnand %p3694_p3, %p3691_p2 }
  0x37   : > { %3699 = shalt.err (!%p3696_p4)
}
  0x38   : > { %s3700_s23 = scalar_lea.vmem %s547_s21, 6144  ;;  %p3708_p9 = scmp.lt.s32.totalorder %s547_s21, %s547_s21 }
  0x39   : > { %p3701_p7 = scmp.ne.s32.totalorder %s547_s21, %s3700_s23  ;;  %p3709_p6 = scmp.lt.s32.totalorder %s3700_s23, %s3700_s23 }
  0x3b   : > { %p3703_p8 = pnand %p3701_p7, %p4190_p0  ;;  %p3710_p5 = por %p3709_p6, %p3708_p9 }
  0x3d   : > { %p3704_p11 = pneg %p3703_p8 }
  0x3f   : > { %p3711_p10 = pnand %p3710_p5, %p3704_p11 }
  0x41   : > { %3714 = shalt.err (!%p3711_p10)
}
  0x42   : > { %s3997_s1 = smov 192   ;;  %s3998_s28 = smov 12  }
  0x43   : > { %3426 = dma.hbm_to_vmem [thread:$0]  (!%p4178_p12), %s4719_s6, 6144, %s547_s21, [#allocation6], %s3997_s1, %s3997_s1, %s3998_s28  }
  0x44   : > { %s3999_s3 = smov [#allocation2]   ;;  %s3715_s20 = scalar_lea.hbm %s4665_s12, 4096 }
  0x45   : > { %s524_s29 = sshll.u32 %s3999_s3, 4  ;;  %p3716_p5 = scmp.ne.s32.totalorder %s4665_s12, %s3715_s20  ;;  %s525_s29 = int_to_ptr.vmem [resolvable:$true] %s524_s29 }
  0x46   : > { %p3722_p10 = scmp.lt.u32.totalorder %s3715_s20, %s4665_s12 }
  0x47   : > { %p3718_p6 = pnand %p3716_p5, %p4190_p0 }
  0x49   : > { %p3719_p9 = pneg %p3718_p6 }
  0x4b   : > { %p3724_p13 = pnand %p3722_p10, %p3719_p9 }
  0x4d   : > { %3727 = shalt.err (!%p3724_p13)
}
  0x4e   : > { %s3728_s21 = scalar_lea.vmem %s585_s25, 4096  ;;  %p3736_p4 = scmp.lt.s32.totalorder %s585_s25, %s585_s25 }
  0x4f   : > { %p3729_p1 = scmp.ne.s32.totalorder %s585_s25, %s3728_s21  ;;  %p3737_p7 = scmp.lt.s32.totalorder %s3728_s21, %s3728_s21 }
  0x51   : > { %p3731_p2 = pnand %p3729_p1, %p4190_p0  ;;  %p3738_p8 = por %p3737_p7, %p3736_p4 }
  0x53   : > { %p3732_p3 = pneg %p3731_p2 }
  0x55   : > { %p3739_p11 = pnand %p3738_p8, %p3732_p3 }
  0x57   : > { %3742 = shalt.err (!%p3739_p11)
}
  0x58   : > { %s4693_s17 = smov 128   ;;  %s4694_s19 = smov 8  }
  0x59   : > { %3432 = dma.hbm_to_vmem [thread:$0]  (!%p4178_p12), %s4665_s12, 4096, %s585_s25, [#allocation9], %s4693_s17, %s4693_s17, %s4694_s19  }
  0x5a   : > { %s4721_s28 = sld [smem:[#allocation32_spill]] }
  0x60   : > { %s3743_s18 = scalar_lea.hbm %s4721_s28, 1024 }
  0x61   : > { %p3744_p5 = scmp.ne.s32.totalorder %s4721_s28, %s3743_s18  ;;  %p3750_p10 = scmp.lt.u32.totalorder %s3743_s18, %s4721_s28 }
  0x63   : > { %p3746_p6 = pnand %p3744_p5, %p4190_p0 }
  0x65   : > { %p3747_p9 = pneg %p3746_p6 }
  0x67   : > { %p3752_p13 = pnand %p3750_p10, %p3747_p9 }
  0x69   : > { %3755 = shalt.err (!%p3752_p13)
}
  0x6a   : > { %s3756_s21 = scalar_lea.vmem %s525_s29, 1024  ;;  %p3764_p4 = scmp.lt.s32.totalorder %s525_s29, %s525_s29 }
  0x6b   : > { %p3757_p1 = scmp.ne.s32.totalorder %s525_s29, %s3756_s21  ;;  %p3765_p7 = scmp.lt.s32.totalorder %s3756_s21, %s3756_s21 }
  0x6d   : > { %p3759_p2 = pnand %p3757_p1, %p4190_p0  ;;  %p3766_p8 = por %p3765_p7, %p3764_p4 }
  0x6f   : > { %p3760_p3 = pneg %p3759_p2 }
  0x71   : > { %p3767_p11 = pnand %p3766_p8, %p3760_p3 }
  0x73   : > { %3770 = shalt.err (!%p3767_p11)
}
  0x74   : > { %3423 = dma.hbm_to_vmem [thread:$0]  (!%p4178_p12), %s4721_s28, 1024, %s525_s29, [#allocation3], %s4693_s17, %s4693_s17, %s4694_s19  }
  0x75   : > { %s4002_s20 = smov [#allocation7]   ;;  %s3771_s24 = scalar_lea.hbm %s4661_s8, 2048 }
  0x76   : > { %s562_s4 = sshll.u32 %s4002_s20, 4  ;;  %p3772_p5 = scmp.ne.s32.totalorder %s4661_s8, %s3771_s24  ;;  %s563_s4 = int_to_ptr.vmem [resolvable:$true] %s562_s4 }
  0x77   : > { %p3778_p10 = scmp.lt.u32.totalorder %s3771_s24, %s4661_s8 }
  0x78   : > { %p3774_p6 = pnand %p3772_p5, %p4190_p0 }
  0x7a   : > { %p3775_p9 = pneg %p3774_p6 }
  0x7c   : > { %p3780_p13 = pnand %p3778_p10, %p3775_p9 }
  0x7e   : > { %3783 = shalt.err (!%p3780_p13)
}
  0x7f   : > { %s3784_s29 = scalar_lea.vmem %s563_s4, 2048  ;;  %p3792_p4 = scmp.lt.s32.totalorder %s563_s4, %s563_s4 }
  0x80   : > { %p3785_p1 = scmp.ne.s32.totalorder %s563_s4, %s3784_s29  ;;  %p3793_p7 = scmp.lt.s32.totalorder %s3784_s29, %s3784_s29 }
  0x82   : > { %p3787_p2 = pnand %p3785_p1, %p4190_p0  ;;  %p3794_p8 = por %p3793_p7, %p3792_p4 }
  0x84   : > { %p3788_p3 = pneg %p3787_p2 }
  0x86   : > { %p3795_p11 = pnand %p3794_p8, %p3788_p3 }
  0x88   : > { %3798 = shalt.err (!%p3795_p11)
}
  0x89   : > { %s4003_s25 = smov 64   ;;  %s4004_s15 = smov 4  }
  0x8a   : > { %3429 = dma.hbm_to_vmem [thread:$0]  (!%p4178_p12), %s4661_s8, 2048, %s563_s4, [#allocation6], %s4003_s25, %s4003_s25, %s4004_s15  }
  0x8b   : > { %s4005_s18 = smov [#allocation10]   ;;  %s4006_s3 = smov [#allocation11]  }
  0x8c   : > { %s600_s24 = sshll.u32 %s4005_s18, 4  ;;  %s616_s27 = sshll.u32 %s4006_s3, 4  ;;  %s601_s24 = int_to_ptr.vmem [resolvable:$true] %s600_s24  ;;  %s4266_s27 = int_to_ptr.vmem [resolvable:$true] %s616_s27 }
  0x8d   : > { %s3799_s29 = scalar_lea.hbm %s4667_s14, 4096 }
  0x8e   : > { %p3800_p5 = scmp.ne.s32.totalorder %s4667_s14, %s3799_s29  ;;  %p3806_p10 = scmp.lt.u32.totalorder %s3799_s29, %s4667_s14 }
  0x90   : > { %p3802_p6 = pnand %p3800_p5, %p4190_p0 }
  0x92   : > { %p3803_p9 = pneg %p3802_p6 }
  0x94   : > { %p3808_p13 = pnand %p3806_p10, %p3803_p9 }
  0x96   : > { %3811 = shalt.err (!%p3808_p13)
}
  0x97   : > { %s3812_s1 = scalar_lea.vmem %s601_s24, 4096  ;;  %p3820_p4 = scmp.lt.s32.totalorder %s601_s24, %s601_s24 }
  0x98   : > { %p3813_p1 = scmp.ne.s32.totalorder %s601_s24, %s3812_s1  ;;  %p3821_p7 = scmp.lt.s32.totalorder %s3812_s1, %s3812_s1 }
  0x9a   : > { %p3815_p2 = pnand %p3813_p1, %p4190_p0  ;;  %p3822_p8 = por %p3821_p7, %p3820_p4 }
  0x9c   : > { %p3816_p3 = pneg %p3815_p2 }
  0x9e   : > { %p3823_p11 = pnand %p3822_p8, %p3816_p3 }
  0xa0   : > { %3826 = shalt.err (!%p3823_p11)
}
  0xa1   : > { %3435 = dma.hbm_to_vmem [thread:$0]  (!%p4178_p12), %s4667_s14, 4096, %s601_s24, [#allocation9], %s4003_s25, %s4003_s25, %s4004_s15  }
  0xa2   : > { %s3827_s23 = scalar_lea.hbm %s4669_s16, 2048 }
  0xa3   : > { %p3828_p5 = scmp.ne.s32.totalorder %s4669_s16, %s3827_s23  ;;  %p3834_p10 = scmp.lt.u32.totalorder %s3827_s23, %s4669_s16 }
  0xa5   : > { %p3830_p6 = pnand %p3828_p5, %p4190_p0 }
  0xa7   : > { %p3831_p9 = pneg %p3830_p6 }
  0xa9   : > { %p3836_p13 = pnand %p3834_p10, %p3831_p9 }
  0xab   : > { %3839 = shalt.err (!%p3836_p13)
}
  0xac   : > { %s3840_s25 = scalar_lea.vmem %s4266_s27, 2048  ;;  %p3848_p4 = scmp.lt.s32.totalorder %s4266_s27, %s4266_s27 }
  0xad   : > { %p3841_p1 = scmp.ne.s32.totalorder %s4266_s27, %s3840_s25  ;;  %p3849_p7 = scmp.lt.s32.totalorder %s3840_s25, %s3840_s25 }
  0xaf   : > { %p3843_p2 = pnand %p3841_p1, %p4190_p0  ;;  %p3850_p8 = por %p3849_p7, %p3848_p4 }
  0xb1   : > { %p3844_p3 = pneg %p3843_p2 }
  0xb3   : > { %p3851_p11 = pnand %p3850_p8, %p3844_p3 }
  0xb5   : > { %3854 = shalt.err (!%p3851_p11)
}
  0xb6   : > { %s4722_s15 = smov 8   ;;  %s4723_s24 = smov 128  }
  0xb7   : > { %3438 = dma.hbm_to_vmem [thread:$0]  (!%p4178_p12), %s4669_s16, 2048, %s4266_s27, [#allocation12], %s4723_s24, %s4723_s24, %s4722_s15  }
  0xb8   : > { %p4724_p5 = scmp.ne.s32.totalorder %s4717_s30, 0 }
  0xb9   : > { %p4725_p0 = scmp.eq.s32.totalorder (!%p4724_p5), %s4140_s2, 0 }
  0xba   : > { %648 = sbr.rel (%p4724_p5) target bundleno = 5285 (0x14a5), region = 92 }
  0xc1   : > { %3956 = dma.done.wait (%p4725_p0), [#allocation3], 1024   ;;  %p4726_p6 = pmov %p4725_p0 }
  0xc2   : > { %p4727_p9 = pmov %p4725_p0 }
  0xc3   : > { %3958 = vsyncadd (%p4726_p6), [#allocation3], 4294966272 }
  0xc4   : > { %3960 = dma.done.wait (%p4727_p9), [#allocation6], 8192   ;;  %p4728_p10 = pmov %p4725_p0 }
  0xc5   : > { %p4729_p13 = pmov %p4725_p0 }
  0xc6   : > { %3962 = vsyncadd (%p4728_p10), [#allocation6], 4294959104 }
  0xc7   : > { %3964 = dma.done.wait (%p4729_p13), [#allocation9], 8192   ;;  %p4730_p12 = pmov %p4725_p0 }
  0xc8   : > { %p4731_p1 = pmov %p4725_p0 }
  0xc9   : > { %3966 = vsyncadd (%p4730_p12), [#allocation9], 4294959104 }
  0xca   : > { %3968 = dma.done.wait (%p4731_p1), [#allocation12], 2048   ;;  %p4732_p2 = pmov %p4725_p0 }
  0xcb   : > { %p737_p3 = scmp.lt.s32.totalorder %s4140_s2, 1  ;;  %v4007_v0 = vmov 0   ;;  %v4008_v1 = vmov 0.0|0.0   ;;  %s4733_s19 = sld [smem:[#allocation30_spill]]  ;;  %v754_v3 = vld [vmem:[#allocation2] sm:$0xff]  ;;  %v755_v4 = vld [vmem:[#allocation2 + $0x8] sm:$0xff]  ;;  %v746_v16 = vlaneseq }
  0xcc   : > { %3970 = vsyncadd (%p4732_p2), [#allocation12], 4294965248  ;;  %3510 = vset.pattern.permute.xlu0 %v4007_v0  ;;  %3354 = vmatprep.subr.bf16.mxu0 %v4008_v1  ;;  %v3355_v5 = vpack.c.bf16 %v755_v4, %v754_v3  ;;  %v756_v6 = vld [vmem:[#allocation2 + $0x10] sm:$0xff]  ;;  %v757_v7 = vld [vmem:[#allocation2 + $0x18] sm:$0xff]  ;;  %vm4009_vm0 = vmmov 0   ;;  %v4010_v10 = vmov 0.0  }
  0xcd   : > { %s4334_s30 = scalar_select %p737_p3, %s4140_s2, 1  ;;  %1078 = vmatprep.mubr.bf16.mxu1 %v4007_v0  ;;  %v758_v8 = vld [vmem:[#allocation2 + $0x20] sm:$0xff]  ;;  %v759_v9 = vld [vmem:[#allocation2 + $0x28] sm:$0xff]  ;;  %3212 = vmatprep.mubr.msk.f32.mxu0 %vm4009_vm0, %v4010_v10  ;;  %v3358_v11 = vpack.c.bf16 %v757_v7, %v756_v6  ;;  %v760_v12 = vld [vmem:[#allocation2 + $0x30] sm:$0xff]  ;;  %v747_v17 = vand.u32 127, %v746_v16  ;;  %vm762_vm1 = vcmask 523264  }
  0xce   : > { %3356 = vmatpush3.bf16.msra.mxu0 %v3355_v5  ;;  %v761_v13 = vld [vmem:[#allocation2 + $0x38] sm:$0xff]  ;;  %v3361_v14 = vpack.c.bf16 %v759_v9, %v758_v8  ;;  %s4734_s21 = sld [smem:[#allocation33_spill]]  ;;  %v3511_v25 = vld [vmem:[#allocation5 + $0x4] ss:$12 sps:$4 sm:$0xff]   ;;  %v3513_v26 = vld [vmem:[#allocation5] ss:$12 sps:$4 sm:$0xff]  }
  0xcf   : > { %s2922_s26 = sshll.u32 %s4334_s30, 3  ;;  %3357 = vmatprep.subr.bf16.mxu0 %v4008_v1  ;;  %v3364_v15 = vpack.c.bf16 %v761_v13, %v760_v12  ;;  %v3514_v27 = vld [vmem:[#allocation5 + $0x8] ss:$12 sps:$4 sm:$0xff]   ;;  %1046 = vmatprep.subr.bf16.mxu1 %v3511_v25  ;;  %v3518_v29 = vld [vmem:[#allocation5 + $0x20] ss:$12 sps:$4 sm:$0xff]   ;;  %s4735_s4 = sld [smem:[#allocation34_spill]] }
  0xd0   : > { %v3515_v28 = vld [vmem:[#allocation5 + $0x1c] ss:$12 sps:$4 sm:$0xff]   ;;  %1047 = vmatpush1.bf16.msra.mxu1 %v3513_v26  ;;  %v3517_v30 = vld [vmem:[#allocation5 + $0x18] ss:$12 sps:$4 sm:$0xff]   ;;  %v3519_v31 = vld [vmem:[#allocation5 + $0x34] ss:$12 sps:$4 sm:$0xff]  }
  0xd1   : > { %s740_s18 = scalar_lea.vmem %s4733_s19, %s2922_s26  ;;  %1048 = vmatprep.subr.bf16.mxu1 %v3515_v28  ;;  %v3521_v36 = vld [vmem:[#allocation5 + $0x30] ss:$12 sps:$4 sm:$0xff]   ;;  %v3522_v37 = vld [vmem:[#allocation5 + $0x38] ss:$12 sps:$4 sm:$0xff]   ;;  %v3525_v39 = vld [vmem:[#allocation5 + $0x48] ss:$12 sps:$4 sm:$0xff]  }
  0xd2   : > { %v745_v2 = vld [vmem:[%s740_s18] sm:$0xff]  ;;  %3359 = vmatpush3.bf16.msra.mxu0 %v3358_v11  ;;  %v3526_v40 = vld [vmem:[#allocation5 + $0x50] ss:$12 sps:$4 sm:$0xff]   ;;  %v3533_v45 = vld [vmem:[#allocation5 + $0x78] ss:$12 sps:$4 sm:$0xff]   ;;  %s4736_s5 = sld [smem:[#allocation35_spill]] }
  0xd3   : > { %749 = vperm.xlu0 %3510, %v745_v2   ;;  %3360 = vmatprep.subr.bf16.mxu0 %v4008_v1  ;;  %v3523_v38 = vld [vmem:[#allocation5 + $0x4c] ss:$12 sps:$4 sm:$0xff]   ;;  %v3527_v41 = vld [vmem:[#allocation5 + $0x64] ss:$12 sps:$4 sm:$0xff]   ;;  %v3530_v43 = vld [vmem:[#allocation5 + $0x68] ss:$12 sps:$4 sm:$0xff]  }
  0xd4   : > { %v836_v21 = vld [vmem:[%s4734_s21] sm:$0xff]  ;;  %1049 = vmatpush1.bf16.msra.mxu1 %v3517_v30  ;;  %v3535_v47 = vld [vmem:[#allocation5 + $0x94] ss:$12 sps:$4 sm:$0xff]   ;;  %v3537_v48 = vld [vmem:[#allocation5 + $0x90] ss:$12 sps:$4 sm:$0xff]   ;;  %v4378_v63 = vshrl.u32 %v746_v16, 7 }
  0xd5   : > { %1050 = vmatprep.subr.bf16.mxu1 %v3519_v31  ;;  %v3529_v42 = vld [vmem:[#allocation5 + $0x60] ss:$12 sps:$4 sm:$0xff]   ;;  %v3531_v44 = vld [vmem:[#allocation5 + $0x7c] ss:$12 sps:$4 sm:$0xff]   ;;  %v3538_v49 = vld [vmem:[#allocation5 + $0x98] ss:$12 sps:$4 sm:$0xff]  }
  0xd6   : > { %3362 = vmatpush3.bf16.msra.mxu0 %v3361_v14  ;;  %v3534_v46 = vld [vmem:[#allocation5 + $0x80] ss:$12 sps:$4 sm:$0xff]   ;;  %v3541_v51 = vld [vmem:[#allocation5 + $0xa8] ss:$12 sps:$4 sm:$0xff]   ;;  %v3542_v52 = vld [vmem:[#allocation5 + $0xb0] ss:$12 sps:$4 sm:$0xff]  }
  0xd7   : > { %3363 = vmatprep.subr.bf16.mxu0 %v4008_v1  ;;  %v3539_v50 = vld [vmem:[#allocation5 + $0xac] ss:$12 sps:$4 sm:$0xff]   ;;  %v2925_v57 = vld [vmem:[%s4735_s4] ss:$0 sm:$0xff]  ;;  %v4381_v2 = vsub.s32 1, %v4378_v63  ;;  %v913_v4 = vsub.s32 2, %v4378_v63 }
  0xd8   : > { %1051 = vmatpush1.bf16.msra.mxu1 %v3521_v36  ;;  %v2926_v59 = vld [vmem:[%s4736_s5] ss:$0 sm:$0xff]  ;;  %v4389_v6 = vsub.s32 0, %v4378_v63  ;;  %vm1195_vm3 = vcmask 1043456   ;;  %s4737_s0 = sld [smem:[#allocation31_spill]]  ;;  %vm1178_vm6 = vcmask 64512  }
  0xd9   : > { %1052 = vmatprep.subr.bf16.mxu1 %v3523_v38  ;;  %v901_v3 = vld [vmem:[%s4660_s7] sm:$0x7]  ;;  %s4740_s26 = sld [smem:[#allocation37_spill]]  ;;  %s4741_s21 = sld [smem:[#allocation28_spill]] }
  0xda   : > { %3365 = vmatpush3.bf16.msra.mxu0 %v3364_v15  ;;  %v910_v5 = vrot.slane %v901_v3, %v4381_v2  ;;  %v914_v9 = vrot.slane %v901_v3, %v913_v4  ;;  %v906_v16 = vrot.slane %v901_v3, %v4389_v6  ;;  %v3624_v30 = vld [vmem:[#allocation7 + $0x48] sm:$0xff]   ;;  %s2674_s29 = sand.u32 1, %s4140_s2   ;;  %s4742_s24 = sld [smem:[#allocation40_spill]] }
  0xdb   : > { %3215 = vmatprep.subr.bf16.mxu0 %v4010_v10  ;;  %s4011_s23 = smov [#allocation14]  }
  0xdc   : > { %1053 = vmatpush1.bf16.msra.mxu1 %v3525_v39 }
  0xdd   : > { %1054 = vmatprep.subr.bf16.mxu1 %v3527_v41 }
  0xde   : > { %s743_s27 = scalar_lea.vmem %s4737_s0, %s4334_s30  ;;  %s4420_s30 = sand.u32 1, %s3985_s22  }
  0xdf   : > { %v839_v26 = vld [vmem:[%s743_s27] sm:$0x1]  ;;  %s2920_s19 = sshll.u32 %s4420_s30, 3  ;;  %s4554_s27 = scalar_lea.sflag [#allocation15], %s2674_s29 }
  0xe0   : > { %1055 = vmatpush1.bf16.msra.mxu1 %v3529_v42  ;;  %vm1170_vm4 = vcmp.eq.f32.partialorder %v839_v26, 0.0  ;;  %v3543_v42 = vld [vmem:[#allocation7] sm:$0xff]   ;;  %s4425_s18 = scalar_lea.vmem [#allocation14], %s2920_s19  ;;  %s4497_s20 = scalar_lea.vmem [#allocation16], %s2920_s19 }
  0xe1   : > { %1056 = vmatprep.subr.bf16.mxu1 %v3531_v44  ;;  %v3545_v44 = vld [vmem:[#allocation7 + $0x10] sm:$0xff]   ;;  %v3569_v26 = vld [vmem:[#allocation8 + $0x60] ss:$8 sps:$4 sm:$0xff]   ;;  %s3078_s19 = sshll.u32 %s4140_s2, 7  ;;  %s4743_s17 = smov %s4742_s24 }
  0xe2   : > { %s4551_s1 = scalar_lea.hbm %s4742_s24, %s3078_s19  ;;  %s2706_s0 = sshll.u32 %s4425_s18, 4  ;;  %s2707_s0 = int_to_ptr.vmem [resolvable:$true] %s2706_s0 }
  0xe3   : > { %s3855_s3 = scalar_lea.vmem %s2707_s0, 128  ;;  %p4744_p7 = scmp.ne.s32.totalorder %s4741_s21, 0 }
  0xe4   : > { %1057 = vmatpush1.bf16.msra.mxu1 %v3533_v45  ;;  %v3546_v45 = vld [vmem:[#allocation7 + $0x18] sm:$0xff]   ;;  %p3856_p4 = scmp.ne.s32.totalorder %s2707_s0, %s3855_s3 }
  0xe5   : > { %1058 = vmatprep.subr.bf16.mxu1 %v3535_v47  ;;  %v3548_v47 = vld [vmem:[#allocation7 + $0x28] sm:$0xff]  }
  0xe6   : > { %p3857_p8 = pnand %p3856_p4, %p4744_p7 }
  0xe8   : > { %1059 = vmatpush1.bf16.msra.mxu1 %v3537_v48  ;;  %v3549_v48 = vld [vmem:[#allocation7 + $0x30] sm:$0xff]   ;;  %p3858_p11 = pneg %p3857_p8 }
  0xe9   : > { %1060 = vmatprep.subr.bf16.mxu1 %v3539_v50 }
  0xec   : > { %1061 = vmatpush1.bf16.msra.mxu1 %v3541_v51 }
  0xed   : > { %3235 = vmatprep.subr.bf16.mxu1 %v4010_v10 }
 0x152   : > { %v750_v18 = vpop.permute.xlu0 %749 }
 0x153   : > { %vm751_vm2 = vcmp.eq.s32.totalorder %v747_v17, %v750_v18 }
 0x154   : > { %v2923_v19 = vsel %vm751_vm2, 1.0, %v4010_v10 }
 0x155   : > { %3213 = vmatmul.mubr.msk.f32.vlgmr.msra.gmra.mrb[0].mxu0 %vm762_vm1, %v2923_v19 }
 0x156   : > { %3231 = vmatprep.mubr.msk.bf16.mxu0 %vm4009_vm0, %v4010_v10  ;;  %3216 = vmatpush3.bf16.msra.mxu0 %v3514_v27  ;;  %v1171_v27 = vsel %vm1170_vm4, 1, %v4007_v0 }
 0x157   : > { %3217 = vmatprep.subr.bf16.mxu0 %v4010_v10  ;;  %v1175_v28 = vrot.slane %v1171_v27, %v4389_v6  ;;  %v3574_v27 = vld [vmem:[#allocation8 + $0x74] ss:$8 sps:$4 sm:$0xff]  }
 0x159   : > { %vm4404_vm5 = vcmp.eq.s32.totalorder %v1175_v28, 1  ;;  %v3572_v28 = vld [vmem:[#allocation8 + $0x70] ss:$8 sps:$4 sm:$0xff]  }
 0x15a   : > { %3218 = vmatpush3.bf16.msra.mxu0 %v3518_v29 }
 0x15b   : > { %3219 = vmatprep.subr.bf16.mxu0 %v4010_v10 }
 0x15e   : > { %3220 = vmatpush3.bf16.msra.mxu0 %v3522_v37 }
 0x15f   : > { %3221 = vmatprep.subr.bf16.mxu0 %v4010_v10 }
 0x162   : > { %3222 = vmatpush3.bf16.msra.mxu0 %v3526_v40 }
 0x163   : > { %3223 = vmatprep.subr.bf16.mxu0 %v4010_v10 }
 0x166   : > { %3224 = vmatpush3.bf16.msra.mxu0 %v3530_v43  ;;  %v3544_v43 = vld [vmem:[#allocation7 + $0x8] sm:$0xff]  }
 0x167   : > { %3225 = vmatprep.subr.bf16.mxu0 %v4010_v10 }
 0x16a   : > { %3226 = vmatpush3.bf16.msra.mxu0 %v3534_v46  ;;  %v3547_v46 = vld [vmem:[#allocation7 + $0x20] sm:$0xff]  }
 0x16b   : > { %3227 = vmatprep.subr.bf16.mxu0 %v4010_v10 }
 0x16e   : > { %3228 = vmatpush3.bf16.msra.mxu0 %v3538_v49 }
 0x16f   : > { %3229 = vmatprep.subr.bf16.mxu0 %v4010_v10 }
 0x172   : > { %3230 = vmatpush3.bf16.msra.mxu0 %v3542_v52 }
 0x173   : > { %3247 = vmatprep.subr.bf16.mxu0 %v4010_v10 }
 0x228   : > { %v832_v20 = vpop.f32.mrb[0].mxu0 }
 0x229   : > { %v837_v22 = vmul.f32 11.313708, %v832_v20  ;;  %v3214_v23 = vpop.f32.mrb[1].mxu0 }
 0x22b   : > { %v4354_v24 = vadd.f32 %v837_v22, %v836_v21 }
 0x22d   : > { %842 = vadd.xlane.f32.xlu0 %v4354_v24 }
 0x2ba   : > { %v843_v32 = vpop.xlane.xlu0 %842 }
 0x2bb   : > { %v845_v33 = vmul.f32 0.0078125, %v843_v32 }
 0x2bd   : > { %v846_v34 = vsub.f32 %v4354_v24, %v845_v33 }
 0x2bf   : > { %v847_v35 = vmul.f32 %v846_v34, %v846_v34 }
 0x2c1   : > { %848 = vadd.xlane.f32.xlu1 %v847_v35 }
 0x34e   : > { %v849_v53 = vpop.xlane.xlu1 %848 }
 0x34f   : > { %v850_v54 = vmul.f32 0.0078125, %v849_v53  ;;  %v3550_v53 = vld [vmem:[#allocation7 + $0x38] sm:$0xff]  }
 0x351   : > { %v851_v55 = vadd.f32 1e-05, %v850_v54 }
 0x353   : > { %3671 = vrsqrt.f32 %v851_v55 }
 0x35d   : > { %v3672_v56 = vpop.eup %3671 }
 0x35e   : > { %v853_v58 = vmul.f32 %v3672_v56, %v846_v34 }
 0x360   : > { %v860_v60 = vmul.f32 %v2925_v57, %v853_v58 }
 0x362   : > { %v867_v61 = vadd.f32 %v2926_v59, %v860_v60  ;;  %v2952_v59 = vld [vmem:[%s4662_s9] ss:$0 sm:$0xff] }
 0x364   : > { %v868_v62 = vpack.c.bf16 %v867_v61, %v867_v61 }
 0x366   : > { %1079 = vmatmul.mubr.bf16.vlgmr.msra.gmra.mrb[0].mxu1 %v868_v62  ;;  %3232 = vmatmul.mubr.bf16.vlgmr.msra.gmra.mrb[4].mxu0 %v868_v62 }
 0x367   : > { %3237 = vmatprep.mubr.msk.bf16.mxu1 %vm4009_vm0, %v4010_v10  ;;  %3263 = vmatprep.mubr.msk.bf16.mxu0 %vm4009_vm0, %v4010_v10 }
 0x368   : > { %3248 = vmatpush3.bf16.msra.mxu0 %v3543_v42 }
 0x369   : > { %3249 = vmatprep.subr.bf16.mxu0 %v4010_v10 }
 0x36c   : > { %3250 = vmatpush3.bf16.msra.mxu0 %v3544_v43 }
 0x36d   : > { %3251 = vmatprep.subr.bf16.mxu0 %v4010_v10 }
 0x370   : > { %3252 = vmatpush3.bf16.msra.mxu0 %v3545_v44 }
 0x371   : > { %3253 = vmatprep.subr.bf16.mxu0 %v4010_v10 }
 0x374   : > { %3254 = vmatpush3.bf16.msra.mxu0 %v3546_v45 }
 0x375   : > { %3255 = vmatprep.subr.bf16.mxu0 %v4010_v10 }
 0x378   : > { %3256 = vmatpush3.bf16.msra.mxu0 %v3547_v46  ;;  %v2961_v46 = vld [vmem:[%s4663_s10] ss:$0 sm:$0xff] }
 0x379   : > { %3257 = vmatprep.subr.bf16.mxu0 %v4010_v10 }
 0x37c   : > { %3258 = vmatpush3.bf16.msra.mxu0 %v3548_v47 }
 0x37d   : > { %3259 = vmatprep.subr.bf16.mxu0 %v4010_v10 }
 0x380   : > { %3260 = vmatpush3.bf16.msra.mxu0 %v3549_v48  ;;  %v2962_v48 = vld [vmem:[%s4664_s11] ss:$0 sm:$0xff] }
 0x381   : > { %3261 = vmatprep.subr.bf16.mxu0 %v4010_v10 }
 0x384   : > { %3262 = vmatpush3.bf16.msra.mxu0 %v3550_v53  ;;  %v3588_v53 = vld [vmem:[#allocation10 + $0x30] sm:$0xff]  }
 0x439   : > { %v1080_v7 = vpop.f32.mrb[0].mxu1  ;;  %v1121_v8 = vpop.f32.mrb[4].mxu0 }
 0x43a   : > { %v1082_v11 = vpop.f32.mrb[1].mxu1  ;;  %v3233_v12 = vpop.f32.mrb[5].mxu0  ;;  %v1122_v20 = vadd.f32 %v1121_v8, %v914_v9  ;;  %v1081_v21 = vadd.f32 %v1080_v7, %v906_v16  ;;  %v3551_v8 = vld [vmem:[#allocation8] ss:$8 sps:$4 sm:$0xff]   ;;  %v3553_v9 = vld [vmem:[#allocation8 + $0x4] ss:$8 sps:$4 sm:$0xff]  }
 0x43b   : > { %v1083_v13 = vadd.f32 %v1082_v11, %v910_v5  ;;  %v1084_v14 = vpop.f32.mrb[2].mxu1  ;;  %v1124_v15 = vpop.f32.mrb[6].mxu0  ;;  %v3556_v11 = vld [vmem:[#allocation8 + $0x14] ss:$8 sps:$4 sm:$0xff]   ;;  %v3554_v12 = vld [vmem:[#allocation8 + $0x10] ss:$8 sps:$4 sm:$0xff]  }
 0x43c   : > { %v1085_v17 = vpop.f32.mrb[3].mxu1  ;;  %v3234_v18 = vpop.f32.mrb[7].mxu0  ;;  %v1191_v22 = vpack.c.bf16 %v1122_v20, %v1122_v20  ;;  %v1127_v23 = vpack.c.bf16 %v1081_v21, %v1081_v21  ;;  %v3557_v14 = vld [vmem:[#allocation8 + $0x20] ss:$8 sps:$4 sm:$0xff]   ;;  %v3565_v21 = vld [vmem:[#allocation8 + $0x44] ss:$8 sps:$4 sm:$0xff]  }
 0x43d   : > { %v1128_v19 = vpack.c.bf16 %v1083_v13, %v1083_v13  ;;  %v3559_v13 = vld [vmem:[#allocation8 + $0x24] ss:$8 sps:$4 sm:$0xff]   ;;  %v3562_v18 = vld [vmem:[#allocation8 + $0x34] ss:$8 sps:$4 sm:$0xff]   ;;  %v3563_v20 = vld [vmem:[#allocation8 + $0x40] ss:$8 sps:$4 sm:$0xff]  }
 0x43e   : > { %v1197_v25 = vsel %vm1195_vm3, %v1191_v22, 0  ;;  %v3568_v22 = vld [vmem:[#allocation8 + $0x54] ss:$8 sps:$4 sm:$0xff]  }
 0x43f   : > { %3236 = vmatpush3.bf16.xpose.msra.mxu1 %v1128_v19  ;;  %v3560_v19 = vld [vmem:[#allocation8 + $0x30] ss:$8 sps:$4 sm:$0xff]  }
 0x440   : > { %3241 = vmatprep.subr.bf16.mxu1 %v4010_v10 }
 0x446   : > { %3238 = vmatmul.mubr.bf16.vlgmr.msra.gmra.mrb[4].mxu1 %v1127_v23  ;;  %v3566_v23 = vld [vmem:[#allocation8 + $0x50] ss:$8 sps:$4 sm:$0xff]  }
 0x447   : > { %3242 = vmatpush3.bf16.msra.mxu1 %v1197_v25  ;;  %3243 = vmatprep.mubr.msk.bf16.mxu1 %vm4009_vm0, %v4010_v10  ;;  %v3571_v25 = vld [vmem:[#allocation8 + $0x64] ss:$8 sps:$4 sm:$0xff]  }
 0x448   : > { %1488 = vmatprep.subr.bf16.mxu1 %v3553_v9 }
 0x519   : > { %v1163_v29 = vpop.f32.mrb[4].mxu1 }
 0x51a   : > { %v1169_v31 = vmul.f32 0.088388346, %v1163_v29  ;;  %v3239_v32 = vpop.f32.mrb[5].mxu1  ;;  %v3575_v29 = vld [vmem:[#allocation10 + $0x40] sm:$0xff]  }
 0x51b   : > { %v1166_v33 = vpop.f32.mrb[6].mxu1  ;;  %v3577_v32 = vld [vmem:[#allocation10 + $0x48] sm:$0xff]   ;;  %3113 = vmatprep.subr.bf16.mxu0 %v3575_v29 }
 0x51c   : > { %v3240_v34 = vpop.f32.mrb[7].mxu1  ;;  %v1177_v35 = vsel %vm4404_vm5, -1e+09, %v1169_v31  ;;  %v3576_v31 = vld [vmem:[#allocation10] sm:$0xff]   ;;  %v3578_v33 = vld [vmem:[#allocation10 + $0x8] sm:$0xff]  }
 0x51d   : > { %v1179_v36 = vsel %vm1178_vm6, %v1177_v35, -inf  ;;  %v3579_v34 = vld [vmem:[#allocation10 + $0x50] sm:$0xff]  }
 0x51e   : > { %1180 = vmax.xlane.f32.xlu1 %v1179_v36  ;;  %v3581_v36 = vld [vmem:[#allocation10 + $0x58] sm:$0xff]  }
 0x5ab   : > { %v1181_v37 = vpop.xlane.xlu1 %1180 }
 0x5ac   : > { %v1182_v38 = vsub.f32 %v1177_v35, %v1181_v37  ;;  %v3580_v35 = vld [vmem:[#allocation10 + $0x10] sm:$0xff]   ;;  %v3582_v37 = vld [vmem:[#allocation10 + $0x18] sm:$0xff]  }
 0x5ae   : > { %v1183_v39 = vmul.f32 1.442695, %v1182_v38  ;;  %v3583_v38 = vld [vmem:[#allocation10 + $0x60] sm:$0xff]  }
 0x5b0   : > { %3673 = vpow2.f32 %v1183_v39  ;;  %v3584_v39 = vld [vmem:[#allocation10 + $0x20] sm:$0xff]  }
 0x5ba   : > { %v3674_v40 = vpop.eup %3673 }
 0x5bb   : > { %v1185_v41 = vsel %vm1178_vm6, %v3674_v40, 0.0 }
 0x5bc   : > { %1186 = vadd.xlane.f32.xlu1 %v1185_v41  ;;  %v3586_v41 = vld [vmem:[#allocation10 + $0x28] sm:$0xff]  }
 0x649   : > { %v1187_v49 = vpop.xlane.xlu1 %1186 }
 0x64a   : > { %3675 = vrcp.f32 %v1187_v49 }
 0x654   : > { %v3676_v50 = vpop.eup %3675 }
 0x655   : > { %v1189_v51 = vmul.f32 %v3676_v50, %v3674_v40  ;;  %v3585_v40 = vld [vmem:[#allocation10 + $0x68] sm:$0xff]  }
 0x657   : > { %v1190_v52 = vpack.c.bf16 %v1189_v51, %v1189_v51  ;;  %1709 = vst.msk [vmem:[%s4425_s18] sm:$0xff] %vm1178_vm6, %v1189_v51 }
 0x659   : > { %3244 = vmatmul.mubr.msk.bf16.vlgmr.msra.gmra.mrb[8].mxu1 %vm1178_vm6, %v1190_v52  ;;  %v3587_v52 = vld [vmem:[#allocation10 + $0x70] sm:$0xff]  }
 0x65a   : > { %1520 = vmatprep.mubr.bf16.mxu1 %v4007_v0  ;;  %1489 = vmatpush1.bf16.msra.mxu1 %v3551_v8 }
 0x65b   : > { %1490 = vmatprep.subr.bf16.mxu1 %v3556_v11 }
 0x65e   : > { %1491 = vmatpush1.bf16.msra.mxu1 %v3554_v12 }
 0x65f   : > { %1492 = vmatprep.subr.bf16.mxu1 %v3559_v13 }
 0x662   : > { %1493 = vmatpush1.bf16.msra.mxu1 %v3557_v14  ;;  %v2979_v14 = vld [vmem:[%s4740_s26] ss:$0 sm:$0xff] }
 0x663   : > { %1494 = vmatprep.subr.bf16.mxu1 %v3562_v18 }
 0x666   : > { %1495 = vmatpush1.bf16.msra.mxu1 %v3560_v19 }
 0x667   : > { %1496 = vmatprep.subr.bf16.mxu1 %v3565_v21  ;;  %v3593_v21 = vld [vmem:[#allocation5 + $0xc4] ss:$12 sps:$4 sm:$0xff]  }
 0x66a   : > { %1497 = vmatpush1.bf16.msra.mxu1 %v3563_v20  ;;  %v3591_v20 = vld [vmem:[#allocation5 + $0xc0] ss:$12 sps:$4 sm:$0xff]  }
 0x66b   : > { %1498 = vmatprep.subr.bf16.mxu1 %v3568_v22  ;;  %v3594_v22 = vld [vmem:[#allocation5 + $0xc8] ss:$12 sps:$4 sm:$0xff]  }
 0x66e   : > { %1499 = vmatpush1.bf16.msra.mxu1 %v3566_v23  ;;  %v3597_v23 = vld [vmem:[#allocation5 + $0xdc] ss:$12 sps:$4 sm:$0xff]  }
 0x66f   : > { %1500 = vmatprep.subr.bf16.mxu1 %v3571_v25  ;;  %v3598_v25 = vld [vmem:[#allocation5 + $0xe0] ss:$12 sps:$4 sm:$0xff]  }
 0x672   : > { %1501 = vmatpush1.bf16.msra.mxu1 %v3569_v26  ;;  %v3595_v26 = vld [vmem:[#allocation5 + $0xd8] ss:$12 sps:$4 sm:$0xff]  }
 0x673   : > { %1502 = vmatprep.subr.bf16.mxu1 %v3574_v27  ;;  %v3601_v27 = vld [vmem:[#allocation5 + $0xf4] ss:$12 sps:$4 sm:$0xff]  }
 0x676   : > { %1503 = vmatpush1.bf16.msra.mxu1 %v3572_v28  ;;  %v3599_v28 = vld [vmem:[#allocation5 + $0xf0] ss:$12 sps:$4 sm:$0xff]  }
 0x677   : > { %1919 = vmatprep.subr.bf16.mxu1 %v3593_v21 }
 0x72c   : > { %v1233_v54 = vpop.f32.mrb[8].mxu1 }
 0x72d   : > { %v1239_v55 = vpack.c.bf16 %v1233_v54, %v1233_v54  ;;  %v3245_v56 = vpop.f32.mrb[9].mxu1  ;;  %v3589_v54 = vld [vmem:[#allocation10 + $0x78] sm:$0xff]  }
 0x72e   : > { %v1236_v57 = vpop.f32.mrb[10].mxu1  ;;  %v1396_v56 = vld [vmem:[%s4666_s13] sm:$0x3] }
 0x72f   : > { %v3246_v58 = vpop.f32.mrb[11].mxu1  ;;  %3264 = vmatmul.mubr.bf16.vlgmr.msra.gmra.mrb[8].mxu0 %v1239_v55  ;;  %v3590_v55 = vld [vmem:[#allocation10 + $0x38] sm:$0xff]   ;;  %v1401_v57 = vrot.slane %v1396_v56, %v4389_v6 }
 0x730   : > { %3114 = vmatpush3.bf16.msra.mxu0 %v3576_v31  ;;  %v1405_v58 = vrot.slane %v1396_v56, %v4381_v2 }
 0x731   : > { %3115 = vmatprep.subr.bf16.mxu0 %v3577_v32 }
 0x734   : > { %3116 = vmatpush3.bf16.msra.mxu0 %v3578_v33  ;;  %v3602_v33 = vld [vmem:[#allocation5 + $0xf8] ss:$12 sps:$4 sm:$0xff]  }
 0x735   : > { %3117 = vmatprep.subr.bf16.mxu0 %v3579_v34  ;;  %v3605_v34 = vld [vmem:[#allocation5 + $0x10c] ss:$12 sps:$4 sm:$0xff]  }
 0x738   : > { %3118 = vmatpush3.bf16.msra.mxu0 %v3580_v35  ;;  %v3603_v35 = vld [vmem:[#allocation5 + $0x108] ss:$12 sps:$4 sm:$0xff]  }
 0x739   : > { %3119 = vmatprep.subr.bf16.mxu0 %v3581_v36  ;;  %v3606_v36 = vld [vmem:[#allocation5 + $0x110] ss:$12 sps:$4 sm:$0xff]  }
 0x73c   : > { %3120 = vmatpush3.bf16.msra.mxu0 %v3582_v37  ;;  %v3607_v37 = vld [vmem:[#allocation5 + $0x120] ss:$12 sps:$4 sm:$0xff]  }
 0x73d   : > { %3121 = vmatprep.subr.bf16.mxu0 %v3583_v38  ;;  %v3609_v38 = vld [vmem:[#allocation5 + $0x124] ss:$12 sps:$4 sm:$0xff]  }
 0x740   : > { %3122 = vmatpush3.bf16.msra.mxu0 %v3584_v39  ;;  %v3610_v39 = vld [vmem:[#allocation5 + $0x128] ss:$12 sps:$4 sm:$0xff]  }
 0x741   : > { %3123 = vmatprep.subr.bf16.mxu0 %v3585_v40  ;;  %v3613_v40 = vld [vmem:[#allocation5 + $0x13c] ss:$12 sps:$4 sm:$0xff]  }
 0x744   : > { %3124 = vmatpush3.bf16.msra.mxu0 %v3586_v41  ;;  %v3611_v41 = vld [vmem:[#allocation5 + $0x138] ss:$12 sps:$4 sm:$0xff]  }
 0x745   : > { %3125 = vmatprep.subr.bf16.mxu0 %v3587_v52 }
 0x748   : > { %3126 = vmatpush3.bf16.msra.mxu0 %v3588_v53  ;;  %v2998_v53 = vld [vmem:[%s4735_s4 + $0x1] ss:$0 sm:$0xff]  ;;  %s3859_s4 = sshll.u32 %s4011_s23, 4  ;;  %s3860_s4 = int_to_ptr.vmem [resolvable:$false] %s3859_s4 }
 0x749   : > { %3127 = vmatprep.subr.bf16.mxu0 %v3589_v54  ;;  %p3862_p5 = scmp.lt.s32.totalorder %s2707_s0, %s3860_s4 }
 0x74c   : > { %3128 = vmatpush3.bf16.msra.mxu0 %v3590_v55  ;;  %v2999_v55 = vld [vmem:[%s4736_s5 + $0x1] ss:$0 sm:$0xff]  ;;  %s3861_s5 = scalar_lea.vmem %s3860_s4, 256 }
 0x74d   : > { %3267 = vmatprep.subr.bf16.mxu0 %v4010_v10  ;;  %p3863_p0 = scmp.lt.s32.totalorder %s3861_s5, %s3855_s3 }
 0x74f   : > { %p3864_p6 = por %p3863_p0, %p3862_p5 }
 0x751   : > { %p3865_p9 = pnand %p3864_p6, %p3858_p11 }
 0x802   : > { %v1345_v60 = vpop.f32.mrb[8].mxu0 }
 0x803   : > { %v1346_v61 = vadd.f32 %v2952_v59, %v1345_v60  ;;  %v3265_v62 = vpop.f32.mrb[9].mxu0 }
 0x804   : > { %v1348_v3 = vpop.f32.mrb[10].mxu0 }
 0x805   : > { %v4435_v5 = vadd.f32 %v1346_v61, %v4354_v24  ;;  %v3266_v7 = vpop.f32.mrb[11].mxu0 }
 0x807   : > { %1354 = vadd.xlane.f32.xlu1 %v4435_v5 }
 0x894   : > { %v1355_v15 = vpop.xlane.xlu1 %1354 }
 0x895   : > { %v1356_v16 = vmul.f32 0.0078125, %v1355_v15 }
 0x897   : > { %v1357_v24 = vsub.f32 %v4435_v5, %v1356_v16 }
 0x899   : > { %v1358_v17 = vmul.f32 %v1357_v24, %v1357_v24 }
 0x89b   : > { %1359 = vadd.xlane.f32.xlu1 %v1358_v17 }
 0x928   : > { %v1360_v42 = vpop.xlane.xlu1 %1359 }
 0x929   : > { %v1361_v43 = vmul.f32 0.0078125, %v1360_v42  ;;  %v3614_v42 = vld [vmem:[#allocation5 + $0x140] ss:$12 sps:$4 sm:$0xff]  }
 0x92b   : > { %v1362_v44 = vadd.f32 1e-05, %v1361_v43  ;;  %v3617_v43 = vld [vmem:[#allocation5 + $0x154] ss:$12 sps:$4 sm:$0xff]  }
 0x92d   : > { %3677 = vrsqrt.f32 %v1362_v44  ;;  %v3615_v44 = vld [vmem:[#allocation5 + $0x150] ss:$12 sps:$4 sm:$0xff]  }
 0x937   : > { %v3678_v45 = vpop.eup %3677 }
 0x938   : > { %v1364_v47 = vmul.f32 %v3678_v45, %v1357_v24  ;;  %v3618_v45 = vld [vmem:[#allocation5 + $0x158] ss:$12 sps:$4 sm:$0xff]  }
 0x93a   : > { %v1371_v49 = vmul.f32 %v2961_v46, %v1364_v47  ;;  %v3621_v46 = vld [vmem:[#allocation5 + $0x16c] ss:$12 sps:$4 sm:$0xff]   ;;  %v3619_v47 = vld [vmem:[#allocation5 + $0x168] ss:$12 sps:$4 sm:$0xff]  }
 0x93c   : > { %v1378_v50 = vadd.f32 %v2962_v48, %v1371_v49  ;;  %v3622_v48 = vld [vmem:[#allocation5 + $0x170] ss:$12 sps:$4 sm:$0xff]  }
 0x93e   : > { %v1379_v51 = vpack.c.bf16 %v1378_v50, %v1378_v50 }
 0x940   : > { %1521 = vmatmul.mubr.bf16.vlgmr.msra.gmra.mrb[12].mxu1 %v1379_v51 }
 0x941   : > { %1951 = vmatprep.mubr.bf16.mxu1 %v4007_v0  ;;  %1920 = vmatpush1.bf16.msra.mxu1 %v3591_v20 }
 0x942   : > { %1921 = vmatprep.subr.bf16.mxu1 %v3597_v23 }
 0x945   : > { %1922 = vmatpush1.bf16.msra.mxu1 %v3595_v26 }
 0x946   : > { %1923 = vmatprep.subr.bf16.mxu1 %v3601_v27 }
 0x949   : > { %1924 = vmatpush1.bf16.msra.mxu1 %v3599_v28 }
 0x94a   : > { %1925 = vmatprep.subr.bf16.mxu1 %v3605_v34 }
 0x94d   : > { %1926 = vmatpush1.bf16.msra.mxu1 %v3603_v35  ;;  %v3623_v35 = vld [vmem:[#allocation7 + $0x40] sm:$0xff]  }
 0x94e   : > { %1927 = vmatprep.subr.bf16.mxu1 %v3609_v38  ;;  %v3626_v38 = vld [vmem:[#allocation7 + $0x58] sm:$0xff]  }
 0x951   : > { %1928 = vmatpush1.bf16.msra.mxu1 %v3607_v37  ;;  %v3625_v37 = vld [vmem:[#allocation7 + $0x50] sm:$0xff]  }
 0x952   : > { %1929 = vmatprep.subr.bf16.mxu1 %v3613_v40  ;;  %v3628_v40 = vld [vmem:[#allocation7 + $0x68] sm:$0xff]  }
 0x955   : > { %1930 = vmatpush1.bf16.msra.mxu1 %v3611_v41  ;;  %v3629_v41 = vld [vmem:[#allocation7 + $0x70] sm:$0xff]  }
 0x956   : > { %1931 = vmatprep.subr.bf16.mxu1 %v3617_v43 }
 0x959   : > { %1932 = vmatpush1.bf16.msra.mxu1 %v3615_v44 }
 0x95a   : > { %1933 = vmatprep.subr.bf16.mxu1 %v3621_v46 }
 0x95d   : > { %1934 = vmatpush1.bf16.msra.mxu1 %v3619_v47 }
 0x95e   : > { %3287 = vmatprep.subr.bf16.mxu1 %v4010_v10 }
 0xa13   : > { %v1522_v59 = vpop.f32.mrb[12].mxu1 }
 0xa14   : > { %v1523_v60 = vadd.f32 %v1522_v59, %v1401_v57  ;;  %v1524_v61 = vpop.f32.mrb[13].mxu1  ;;  %v3000_v59 = vld [vmem:[%s4660_s7 + $0x3] sm:$0x7] }
 0xa15   : > { %v1525_v62 = vadd.f32 %v1524_v61, %v1405_v58  ;;  %v1526_v3 = vpop.f32.mrb[14].mxu1 }
 0xa16   : > { %v1529_v7 = vmax.f32 %v1523_v60, 0.0  ;;  %v1527_v8 = vpop.f32.mrb[15].mxu1  ;;  %v1783_v60 = vrot.slane %v3000_v59, %v4381_v2  ;;  %v1787_v3 = vrot.slane %v3000_v59, %v913_v4 }
 0xa17   : > { %v1530_v9 = vmax.f32 %v1525_v62, 0.0 }
 0xa18   : > { %v1531_v12 = vpack.c.bf16 %v1529_v7, %v1529_v7 }
 0xa19   : > { %v1532_v11 = vpack.c.bf16 %v1530_v9, %v1530_v9 }
 0xa1b   : > { %1700 = vmatprep.mubr.bf16.mxu0 %v1532_v11 }
 0xa1c   : > { %1701 = vmatmul.mubr.bf16.vlgmr.msra.gmra.mrb[12].mxu0 %v1531_v12 }
 0xa1d   : > { %3283 = vmatprep.mubr.msk.bf16.mxu0 %vm4009_vm0, %v4010_v10  ;;  %3268 = vmatpush3.bf16.msra.mxu0 %v3594_v22 }
 0xa1e   : > { %3269 = vmatprep.subr.bf16.mxu0 %v4010_v10 }
 0xa21   : > { %3270 = vmatpush3.bf16.msra.mxu0 %v3598_v25 }
 0xa22   : > { %3271 = vmatprep.subr.bf16.mxu0 %v4010_v10 }
 0xa25   : > { %3272 = vmatpush3.bf16.msra.mxu0 %v3602_v33 }
 0xa26   : > { %3273 = vmatprep.subr.bf16.mxu0 %v4010_v10 }
 0xa29   : > { %3274 = vmatpush3.bf16.msra.mxu0 %v3606_v36 }
 0xa2a   : > { %3275 = vmatprep.subr.bf16.mxu0 %v4010_v10 }
 0xa2d   : > { %3276 = vmatpush3.bf16.msra.mxu0 %v3610_v39  ;;  %v3627_v39 = vld [vmem:[#allocation7 + $0x60] sm:$0xff]  }
 0xa2e   : > { %3277 = vmatprep.subr.bf16.mxu0 %v4010_v10 }
 0xa31   : > { %3278 = vmatpush3.bf16.msra.mxu0 %v3614_v42  ;;  %v3630_v42 = vld [vmem:[#allocation7 + $0x78] sm:$0xff]  }
 0xa32   : > { %3279 = vmatprep.subr.bf16.mxu0 %v4010_v10 }
 0xa35   : > { %3280 = vmatpush3.bf16.msra.mxu0 %v3618_v45 }
 0xa36   : > { %3281 = vmatprep.subr.bf16.mxu0 %v4010_v10 }
 0xa39   : > { %3282 = vmatpush3.bf16.msra.mxu0 %v3622_v48  ;;  %v3027_v48 = vld [vmem:[%s4662_s9 + $0x1] ss:$0 sm:$0xff] }
 0xaef   : > { %v3129_v13 = vpop.f32.mrb[12].mxu0 }
 0xaf0   : > { %v3130_v15 = vpop.f32.mrb[13].mxu0 }
 0xaf1   : > { %v3131_v16 = vadd.f32 %v3130_v15, %v3129_v13  ;;  %v3132_v24 = vpop.f32.mrb[14].mxu0  ;;  %v1779_v13 = vrot.slane %v3000_v59, %v4389_v6  ;;  %v3639_v59 = vld [vmem:[#allocation8 + $0xa4] ss:$8 sps:$4 sm:$0xff]  }
 0xaf2   : > { %v3133_v17 = vpop.f32.mrb[15].mxu0 }
 0xaf3   : > { %v1703_v18 = vadd.f32 %v3131_v16, %v2979_v14 }
 0xaf5   : > { %v4458_v19 = vadd.f32 %v1703_v18, %v4435_v5 }
 0xaf7   : > { %1714 = vadd.xlane.f32.xlu1 %v4458_v19 }
 0xb84   : > { %v1715_v5 = vpop.xlane.xlu1 %1714 }
 0xb85   : > { %v1716_v29 = vmul.f32 0.0078125, %v1715_v5 }
 0xb87   : > { %v1717_v31 = vsub.f32 %v4458_v19, %v1716_v29 }
 0xb89   : > { %v1718_v32 = vmul.f32 %v1717_v31, %v1717_v31 }
 0xb8b   : > { %1719 = vadd.xlane.f32.xlu1 %v1718_v32 }
 0xc18   : > { %v1720_v49 = vpop.xlane.xlu1 %1719 }
 0xc19   : > { %v1721_v50 = vmul.f32 0.0078125, %v1720_v49 }
 0xc1b   : > { %v1722_v51 = vadd.f32 1e-05, %v1721_v50 }
 0xc1d   : > { %3679 = vrsqrt.f32 %v1722_v51 }
 0xc27   : > { %v3680_v52 = vpop.eup %3679 }
 0xc28   : > { %v1724_v54 = vmul.f32 %v3680_v52, %v1717_v31 }
 0xc2a   : > { %v1731_v56 = vmul.f32 %v2998_v53, %v1724_v54 }
 0xc2c   : > { %v1738_v57 = vadd.f32 %v2999_v55, %v1731_v56  ;;  %v3631_v55 = vld [vmem:[#allocation8 + $0x80] ss:$8 sps:$4 sm:$0xff]   ;;  %v3633_v56 = vld [vmem:[#allocation8 + $0x84] ss:$8 sps:$4 sm:$0xff]  }
 0xc2d   : > { %2358 = vmatprep.subr.bf16.mxu0 %v3633_v56  ;;  %v2592_v56 = vld [vmem:[#allocation11 + $0x50] sm:$0xff] }
 0xc2e   : > { %v1739_v58 = vpack.c.bf16 %v1738_v57, %v1738_v57  ;;  %v3636_v57 = vld [vmem:[#allocation8 + $0x94] ss:$8 sps:$4 sm:$0xff]  }
 0xc30   : > { %1952 = vmatmul.mubr.bf16.vlgmr.msra.gmra.mrb[16].mxu1 %v1739_v58  ;;  %3284 = vmatmul.mubr.bf16.vlgmr.msra.gmra.mrb[16].mxu0 %v1739_v58  ;;  %v3634_v58 = vld [vmem:[#allocation8 + $0x90] ss:$8 sps:$4 sm:$0xff]  }
 0xc31   : > { %3289 = vmatprep.mubr.msk.bf16.mxu1 %vm4009_vm0, %v4010_v10  ;;  %2390 = vmatprep.mubr.bf16.mxu0 %v4007_v0 }
 0xc32   : > { %2359 = vmatpush1.bf16.msra.mxu0 %v3631_v55 }
 0xc33   : > { %2360 = vmatprep.subr.bf16.mxu0 %v3636_v57  ;;  %v2593_v57 = vld [vmem:[#allocation11 + $0x58] sm:$0xff] }
 0xc36   : > { %2361 = vmatpush1.bf16.msra.mxu0 %v3634_v58  ;;  %v3382_v58 = vpack.c.bf16 %v2593_v57, %v2592_v56 }
 0xc37   : > { %2362 = vmatprep.subr.bf16.mxu0 %v3639_v59  ;;  %v3040_v59 = vld [vmem:[%s4666_s13 + $0x2] sm:$0x3] }
 0xd03   : > { %v1953_v61 = vpop.f32.mrb[16].mxu1  ;;  %v1994_v62 = vpop.f32.mrb[16].mxu0 }
 0xd04   : > { %v1955_v7 = vpop.f32.mrb[17].mxu1  ;;  %v3285_v8 = vpop.f32.mrb[17].mxu0  ;;  %v1995_v16 = vadd.f32 %v1994_v62, %v1787_v3  ;;  %v1954_v24 = vadd.f32 %v1953_v61, %v1779_v13  ;;  %v3646_v13 = vld [vmem:[#allocation8 + $0xd0] ss:$8 sps:$4 sm:$0xff]  }
 0xd05   : > { %v1956_v9 = vadd.f32 %v1955_v7, %v1783_v60  ;;  %v1957_v11 = vpop.f32.mrb[18].mxu1  ;;  %v1997_v12 = vpop.f32.mrb[18].mxu0  ;;  %v3637_v60 = vld [vmem:[#allocation8 + $0xa0] ss:$8 sps:$4 sm:$0xff]   ;;  %v3642_v7 = vld [vmem:[#allocation8 + $0xb4] ss:$8 sps:$4 sm:$0xff]  }
 0xd06   : > { %v1958_v14 = vpop.f32.mrb[19].mxu1  ;;  %v3286_v0 = vpop.f32.mrb[19].mxu0  ;;  %v2056_v17 = vpack.c.bf16 %v1995_v16, %v1995_v16  ;;  %v2000_v18 = vpack.c.bf16 %v1954_v24, %v1954_v24  ;;  %2363 = vmatpush1.bf16.msra.mxu0 %v3637_v60  ;;  %v3640_v8 = vld [vmem:[#allocation8 + $0xb0] ss:$8 sps:$4 sm:$0xff]   ;;  %v3643_v11 = vld [vmem:[#allocation8 + $0xc0] ss:$8 sps:$4 sm:$0xff]   ;;  %v2271_v60 = vrot.slane %v3040_v59, %v4389_v6 }
 0xd07   : > { %v2001_v15 = vpack.c.bf16 %v1956_v9, %v1956_v9  ;;  %2364 = vmatprep.subr.bf16.mxu0 %v3642_v7  ;;  %v3645_v9 = vld [vmem:[#allocation8 + $0xc4] ss:$8 sps:$4 sm:$0xff]   ;;  %v3648_v12 = vld [vmem:[#allocation8 + $0xd4] ss:$8 sps:$4 sm:$0xff]   ;;  %v3649_v0 = vld [vmem:[#allocation8 + $0xe0] ss:$8 sps:$4 sm:$0xff]  }
 0xd08   : > { %v2061_v63 = vsel %vm1195_vm3, %v2056_v17, 0  ;;  %v3651_v14 = vld [vmem:[#allocation8 + $0xe4] ss:$8 sps:$4 sm:$0xff]   ;;  %v3652_v16 = vld [vmem:[#allocation8 + $0xf0] ss:$8 sps:$4 sm:$0xff]  }
 0xd09   : > { %3288 = vmatpush3.bf16.xpose.msra.mxu1 %v2001_v15  ;;  %v3654_v15 = vld [vmem:[#allocation8 + $0xf4] ss:$8 sps:$4 sm:$0xff]   ;;  %v3655_v24 = vld [vmem:[#allocation10 + $0xc0] sm:$0xff]  }
 0xd0a   : > { %3293 = vmatprep.subr.bf16.mxu1 %v4010_v10  ;;  %2365 = vmatpush1.bf16.msra.mxu0 %v3640_v8  ;;  %v3656_v17 = vld [vmem:[#allocation10 + $0x80] sm:$0xff]   ;;  %v2597_v6 = vld [vmem:[#allocation11 + $0x78] sm:$0xff] }
 0xd0b   : > { %2366 = vmatprep.subr.bf16.mxu0 %v3645_v9 }
 0xd0e   : > { %2367 = vmatpush1.bf16.msra.mxu0 %v3643_v11 }
 0xd0f   : > { %2368 = vmatprep.subr.bf16.mxu0 %v3648_v12 }
 0xd10   : > { %3290 = vmatmul.mubr.bf16.vlgmr.msra.gmra.mrb[20].mxu1 %v2000_v18  ;;  %v3657_v18 = vld [vmem:[#allocation10 + $0xc8] sm:$0xff]  }
 0xd11   : > { %3294 = vmatpush3.bf16.msra.mxu1 %v2061_v63  ;;  %3295 = vmatprep.mubr.msk.bf16.mxu1 %vm4009_vm0, %v4010_v10  ;;  %v3658_v63 = vld [vmem:[#allocation10 + $0x88] sm:$0xff]  }
 0xd12   : > { %3299 = vmatprep.subr.bf16.mxu1 %v4010_v10  ;;  %2369 = vmatpush1.bf16.msra.mxu0 %v3646_v13 }
 0xd13   : > { %2370 = vmatprep.subr.bf16.mxu0 %v3651_v14 }
 0xd16   : > { %2371 = vmatpush1.bf16.msra.mxu0 %v3649_v0  ;;  %v2594_v0 = vld [vmem:[#allocation11 + $0x60] sm:$0xff] }
 0xd17   : > { %2372 = vmatprep.subr.bf16.mxu0 %v3654_v15  ;;  %v2595_v15 = vld [vmem:[#allocation11 + $0x68] sm:$0xff] }
 0xd1a   : > { %2373 = vmatpush1.bf16.msra.mxu0 %v3652_v16  ;;  %v3385_v16 = vpack.c.bf16 %v2595_v15, %v2594_v0 }
 0xd1b   : > { %3366 = vmatprep.subr.bf16.mxu0 %v4008_v1 }
 0xde3   : > { %v2036_v4 = vpop.f32.mrb[20].mxu1 }
 0xde4   : > { %v2042_v20 = vmul.f32 0.088388346, %v2036_v4  ;;  %v3291_v21 = vpop.f32.mrb[21].mxu1  ;;  %v3659_v4 = vld [vmem:[#allocation10 + $0xd0] sm:$0xff]  }
 0xde5   : > { %v2039_v22 = vpop.f32.mrb[22].mxu1  ;;  %v3661_v21 = vld [vmem:[#allocation10 + $0xd8] sm:$0xff]  }
 0xde6   : > { %v3292_v23 = vpop.f32.mrb[23].mxu1  ;;  %v2043_v25 = vsel %vm4404_vm5, -1e+09, %v2042_v20  ;;  %v3660_v20 = vld [vmem:[#allocation10 + $0x90] sm:$0xff]   ;;  %v3662_v22 = vld [vmem:[#allocation10 + $0x98] sm:$0xff]  }
 0xde7   : > { %v2044_v26 = vsel %vm1178_vm6, %v2043_v25, -inf  ;;  %v3663_v23 = vld [vmem:[#allocation10 + $0xe0] sm:$0xff]  }
 0xde8   : > { %2045 = vmax.xlane.f32.xlu1 %v2044_v26  ;;  %v3665_v26 = vld [vmem:[#allocation10 + $0xe8] sm:$0xff]  }
 0xe75   : > { %v2046_v27 = vpop.xlane.xlu1 %2045 }
 0xe76   : > { %v2047_v28 = vsub.f32 %v2043_v25, %v2046_v27  ;;  %v3664_v25 = vld [vmem:[#allocation10 + $0xa0] sm:$0xff]   ;;  %v3666_v27 = vld [vmem:[#allocation10 + $0xa8] sm:$0xff]  }
 0xe78   : > { %v2048_v5 = vmul.f32 1.442695, %v2047_v28 }
 0xe7a   : > { %3681 = vpow2.f32 %v2048_v5 }
 0xe84   : > { %v3682_v29 = vpop.eup %3681 }
 0xe85   : > { %v2050_v31 = vsel %vm1178_vm6, %v3682_v29, 0.0 }
 0xe86   : > { %2051 = vadd.xlane.f32.xlu1 %v2050_v31 }
 0xf13   : > { %v2052_v32 = vpop.xlane.xlu1 %2051 }
 0xf14   : > { %3683 = vrcp.f32 %v2052_v32  ;;  %v3038_v32 = vld [vmem:[%s4663_s10 + $0x1] ss:$0 sm:$0xff] }
 0xf1e   : > { %v3684_v33 = vpop.eup %3683 }
 0xf1f   : > { %v2054_v34 = vmul.f32 %v3684_v33, %v3682_v29 }
 0xf21   : > { %v2055_v36 = vpack.c.bf16 %v2054_v34, %v2054_v34  ;;  %2581 = vst.msk [vmem:[%s4497_s20] sm:$0xff] %vm1178_vm6, %v2054_v34  ;;  %v3039_v34 = vld [vmem:[%s4664_s11 + $0x1] ss:$0 sm:$0xff] }
 0xf23   : > { %3296 = vmatmul.mubr.msk.bf16.vlgmr.msra.gmra.mrb[24].mxu1 %vm1178_vm6, %v2055_v36 }
 0xf24   : > { %3300 = vmatpush3.bf16.msra.mxu1 %v3623_v35  ;;  %3315 = vmatprep.mubr.msk.bf16.mxu1 %vm4009_vm0, %v4010_v10 }
 0xf25   : > { %3301 = vmatprep.subr.bf16.mxu1 %v4010_v10 }
 0xf28   : > { %3302 = vmatpush3.bf16.msra.mxu1 %v3624_v30 }
 0xf29   : > { %3303 = vmatprep.subr.bf16.mxu1 %v4010_v10 }
 0xf2c   : > { %3304 = vmatpush3.bf16.msra.mxu1 %v3625_v37  ;;  %v3667_v37 = vld [vmem:[#allocation10 + $0xf0] sm:$0xff]  }
 0xf2d   : > { %3305 = vmatprep.subr.bf16.mxu1 %v4010_v10 }
 0xf30   : > { %3306 = vmatpush3.bf16.msra.mxu1 %v3626_v38  ;;  %v3668_v38 = vld [vmem:[#allocation10 + $0xb0] sm:$0xff]  }
 0xf31   : > { %3307 = vmatprep.subr.bf16.mxu1 %v4010_v10 }
 0xf34   : > { %3308 = vmatpush3.bf16.msra.mxu1 %v3627_v39  ;;  %v3669_v39 = vld [vmem:[#allocation10 + $0xf8] sm:$0xff]  }
 0xf35   : > { %3309 = vmatprep.subr.bf16.mxu1 %v4010_v10 }
 0xf38   : > { %3310 = vmatpush3.bf16.msra.mxu1 %v3628_v40  ;;  %v3670_v40 = vld [vmem:[#allocation10 + $0xb8] sm:$0xff]  }
 0xf39   : > { %3311 = vmatprep.subr.bf16.mxu1 %v4010_v10 }
 0xf3c   : > { %3312 = vmatpush3.bf16.msra.mxu1 %v3629_v41  ;;  %v2582_v41 = vld [vmem:[#allocation11] sm:$0xff] }
 0xf3d   : > { %3313 = vmatprep.subr.bf16.mxu1 %v4010_v10 }
 0xf40   : > { %3314 = vmatpush3.bf16.msra.mxu1 %v3630_v42  ;;  %v2583_v42 = vld [vmem:[#allocation11 + $0x8] sm:$0xff] }
 0xf41   : > { %3157 = vmatprep.subr.bf16.mxu1 %v3655_v24 }
 0xff6   : > { %v2097_v43 = vpop.f32.mrb[24].mxu1 }
 0xff7   : > { %v2103_v44 = vpack.c.bf16 %v2097_v43, %v2097_v43  ;;  %v3297_v45 = vpop.f32.mrb[25].mxu1  ;;  %v2584_v43 = vld [vmem:[#allocation11 + $0x10] sm:$0xff] }
 0xff8   : > { %v2100_v46 = vpop.f32.mrb[26].mxu1  ;;  %v2585_v45 = vld [vmem:[#allocation11 + $0x18] sm:$0xff] }
 0xff9   : > { %v3298_v47 = vpop.f32.mrb[27].mxu1  ;;  %3316 = vmatmul.mubr.bf16.vlgmr.msra.gmra.mrb[28].mxu1 %v2103_v44  ;;  %v3367_v44 = vpack.c.bf16 %v2583_v42, %v2582_v41  ;;  %v3370_v46 = vpack.c.bf16 %v2585_v45, %v2584_v43 }
 0xffa   : > { %3158 = vmatpush3.bf16.msra.mxu1 %v3656_v17  ;;  %v2586_v47 = vld [vmem:[#allocation11 + $0x20] sm:$0xff] }
 0xffb   : > { %3159 = vmatprep.subr.bf16.mxu1 %v3657_v18  ;;  %v3058_v18 = vld [vmem:[%s4740_s26 + $0x1] ss:$0 sm:$0xff] }
 0xffe   : > { %3160 = vmatpush3.bf16.msra.mxu1 %v3658_v63 }
 0xfff   : > { %3161 = vmatprep.subr.bf16.mxu1 %v3659_v4 }
0x1002   : > { %3162 = vmatpush3.bf16.msra.mxu1 %v3660_v20 }
0x1003   : > { %3163 = vmatprep.subr.bf16.mxu1 %v3661_v21 }
0x1006   : > { %3164 = vmatpush3.bf16.msra.mxu1 %v3662_v22 }
0x1007   : > { %3165 = vmatprep.subr.bf16.mxu1 %v3663_v23 }
0x100a   : > { %3166 = vmatpush3.bf16.msra.mxu1 %v3664_v25 }
0x100b   : > { %3167 = vmatprep.subr.bf16.mxu1 %v3665_v26 }
0x100e   : > { %3168 = vmatpush3.bf16.msra.mxu1 %v3666_v27 }
0x100f   : > { %3169 = vmatprep.subr.bf16.mxu1 %v3667_v37 }
0x1012   : > { %3170 = vmatpush3.bf16.msra.mxu1 %v3668_v38 }
0x1013   : > { %3171 = vmatprep.subr.bf16.mxu1 %v3669_v39 }
0x1016   : > { %3172 = vmatpush3.bf16.msra.mxu1 %v3670_v40 }
0x10cc   : > { %v2211_v49 = vpop.f32.mrb[28].mxu1 }
0x10cd   : > { %v2212_v50 = vadd.f32 %v3027_v48, %v2211_v49  ;;  %v3317_v51 = vpop.f32.mrb[29].mxu1  ;;  %v2587_v48 = vld [vmem:[#allocation11 + $0x28] sm:$0xff]  ;;  %v2588_v49 = vld [vmem:[#allocation11 + $0x30] sm:$0xff] }
0x10ce   : > { %v2214_v52 = vpop.f32.mrb[30].mxu1 }
0x10cf   : > { %v4515_v53 = vadd.f32 %v2212_v50, %v4458_v19  ;;  %v3318_v54 = vpop.f32.mrb[31].mxu1  ;;  %v2589_v50 = vld [vmem:[#allocation11 + $0x38] sm:$0xff]  ;;  %v2590_v52 = vld [vmem:[#allocation11 + $0x40] sm:$0xff] }
0x10d0   : > { %v3376_v51 = vpack.c.bf16 %v2589_v50, %v2588_v49  ;;  %v2591_v54 = vld [vmem:[#allocation11 + $0x48] sm:$0xff] }
0x10d1   : > { %2222 = vadd.xlane.f32.xlu0 %v4515_v53  ;;  %v3379_v55 = vpack.c.bf16 %v2591_v54, %v2590_v52 }
0x115e   : > { %v2223_v61 = vpop.xlane.xlu0 %2222 }
0x115f   : > { %v2224_v62 = vmul.f32 0.0078125, %v2223_v61  ;;  %v2275_v61 = vrot.slane %v3040_v59, %v4381_v2  ;;  %v2596_v2 = vld [vmem:[#allocation11 + $0x70] sm:$0xff] }
0x1160   : > { %v3388_v24 = vpack.c.bf16 %v2597_v6, %v2596_v2 }
0x1161   : > { %v2225_v19 = vsub.f32 %v4515_v53, %v2224_v62 }
0x1163   : > { %v2226_v3 = vmul.f32 %v2225_v19, %v2225_v19 }
0x1165   : > { %2227 = vadd.xlane.f32.xlu1 %v2226_v3 }
0x11f2   : > { %v2228_v28 = vpop.xlane.xlu1 %2227 }
0x11f3   : > { %v2229_v5 = vmul.f32 0.0078125, %v2228_v28 }
0x11f5   : > { %v2230_v29 = vadd.f32 1e-05, %v2229_v5 }
0x11f7   : > { %3685 = vrsqrt.f32 %v2230_v29 }
0x1201   : > { %v3686_v31 = vpop.eup %3685 }
0x1202   : > { %v2232_v33 = vmul.f32 %v3686_v31, %v2225_v19 }
0x1204   : > { %v2239_v35 = vmul.f32 %v3038_v32, %v2232_v33 }
0x1206   : > { %v2246_v36 = vadd.f32 %v3039_v34, %v2239_v35 }
0x1208   : > { %v2247_v30 = vpack.c.bf16 %v2246_v36, %v2246_v36 }
0x120a   : > { %2391 = vmatmul.mubr.bf16.vlgmr.msra.gmra.mrb[20].mxu0 %v2247_v30 }
0x120b   : > { %3351 = vmatprep.mubr.msk.f32.mxu0 %vm4009_vm0, %v4010_v10  ;;  %3368 = vmatpush3.bf16.msra.mxu0 %v3367_v44  ;;  %v3373_v10 = vpack.c.bf16 %v2587_v48, %v2586_v47 }
0x120c   : > { %3369 = vmatprep.subr.bf16.mxu0 %v4008_v1 }
0x120f   : > { %3371 = vmatpush3.bf16.msra.mxu0 %v3370_v46 }
0x1210   : > { %3372 = vmatprep.subr.bf16.mxu0 %v4008_v1 }
0x1213   : > { %3374 = vmatpush3.bf16.msra.mxu0 %v3373_v10 }
0x1214   : > { %3375 = vmatprep.subr.bf16.mxu0 %v4008_v1 }
0x1217   : > { %3377 = vmatpush3.bf16.msra.mxu0 %v3376_v51 }
0x1218   : > { %3378 = vmatprep.subr.bf16.mxu0 %v4008_v1 }
0x121b   : > { %3380 = vmatpush3.bf16.msra.mxu0 %v3379_v55 }
0x121c   : > { %3381 = vmatprep.subr.bf16.mxu0 %v4008_v1 }
0x121f   : > { %3383 = vmatpush3.bf16.msra.mxu0 %v3382_v58 }
0x1220   : > { %3384 = vmatprep.subr.bf16.mxu0 %v4008_v1 }
0x1223   : > { %3386 = vmatpush3.bf16.msra.mxu0 %v3385_v16 }
0x1224   : > { %3387 = vmatprep.subr.bf16.mxu0 %v4008_v1 }
0x1227   : > { %3389 = vmatpush3.bf16.msra.mxu0 %v3388_v24 }
0x12dd   : > { %v2392_v62 = vpop.f32.mrb[20].mxu0 }
0x12de   : > { %v2393_v19 = vadd.f32 %v2392_v62, %v2271_v60  ;;  %v2394_v3 = vpop.f32.mrb[21].mxu0 }
0x12df   : > { %v2395_v7 = vadd.f32 %v2394_v3, %v2275_v61  ;;  %v2396_v8 = vpop.f32.mrb[22].mxu0 }
0x12e0   : > { %v2399_v9 = vmax.f32 %v2393_v19, 0.0  ;;  %v2397_v11 = vpop.f32.mrb[23].mxu0 }
0x12e1   : > { %v2400_v12 = vmax.f32 %v2395_v7, 0.0 }
0x12e2   : > { %v2401_v14 = vpack.c.bf16 %v2399_v9, %v2399_v9 }
0x12e3   : > { %v2402_v13 = vpack.c.bf16 %v2400_v12, %v2400_v12 }
0x12e5   : > { %2572 = vmatprep.mubr.bf16.mxu1 %v2402_v13 }
0x12e6   : > { %2573 = vmatmul.mubr.bf16.vlgmr.msra.gmra.mrb[32].mxu1 %v2401_v14 }
0x13b9   : > { %v3173_v17 = vpop.f32.mrb[32].mxu1 }
0x13ba   : > { %v3174_v63 = vpop.f32.mrb[33].mxu1 }
0x13bb   : > { %v3175_v4 = vadd.f32 %v3174_v63, %v3173_v17  ;;  %v3176_v20 = vpop.f32.mrb[34].mxu1 }
0x13bc   : > { %v3177_v21 = vpop.f32.mrb[35].mxu1 }
0x13bd   : > { %v2575_v22 = vadd.f32 %v3175_v4, %v3058_v18 }
0x13bf   : > { %v2580_v23 = vadd.f32 %v2575_v22, %v4515_v53 }
0x13c1   : > { %3352 = vmatmul.mubr.f32.vlgmr.msra.gmra.mrb[2].mxu0 %v2580_v23 }
0x13c2   : > { %3868 = shalt.err (!%p3865_p9)
}
0x13c3   : > { %s3869_s18 = scalar_lea.hbm %s4551_s1, 128  ;;  %s3873_s15 = scalar_lea.hbm %s4743_s17, 256 }
0x13c4   : > { %p3870_p10 = scmp.ne.s32.totalorder %s4551_s1, %s3869_s18  ;;  %p3874_p1 = scmp.lt.u32.totalorder %s4551_s1, %s4743_s17 }
0x13c5   : > { %p3875_p2 = scmp.lt.u32.totalorder %s3873_s15, %s3869_s18  ;;  %p3877_p4 = scmp.lt.u32.totalorder %s3869_s18, %s4551_s1 }
0x13c6   : > { %p3871_p13 = pnand %p3870_p10, %p4744_p7 }
0x13c7   : > { %p3876_p3 = por %p3875_p2, %p3874_p1 }
0x13c8   : > { %p3872_p12 = pneg %p3871_p13 }
0x13c9   : > { %p3878_p8 = por %p3877_p4, %p3876_p3 }
0x13cb   : > { %p3879_p11 = pnand %p3878_p8, %p3872_p12 }
0x13cd   : > { %3882 = shalt.err (!%p3879_p11)
}
0x13ce   : > { %3415 = dma.vmem_to_hbm [thread:$0]  (%p4744_p7), %s2707_s0, 128, %s4551_s1, %s4554_s27  }
0x13cf   : > { %s4745_s23 = sld [smem:[#allocation41_spill]]  ;;  %s2719_s15 = sshll.u32 %s4497_s20, 4  ;;  %s2720_s15 = int_to_ptr.vmem [resolvable:$true] %s2719_s15 }
0x13d0   : > { %s3883_s18 = scalar_lea.vmem %s2720_s15, 128  ;;  %s4012_s24 = smov [#allocation16]  }
0x13d1   : > { %p3884_p5 = scmp.ne.s32.totalorder %s2720_s15, %s3883_s18  ;;  %s3887_s4 = sshll.u32 %s4012_s24, 4  ;;  %s3888_s4 = int_to_ptr.vmem [resolvable:$false] %s3887_s4 }
0x13d2   : > { %s3889_s6 = scalar_lea.vmem %s3888_s4, 256  ;;  %p3890_p9 = scmp.lt.s32.totalorder %s2720_s15, %s3888_s4 }
0x13d3   : > { %p3885_p0 = pnand %p3884_p5, %p4744_p7  ;;  %p3891_p10 = scmp.lt.s32.totalorder %s3889_s6, %s3883_s18 }
0x13d5   : > { %s4746_s29 = smov %s4745_s23  ;;  %s4579_s25 = scalar_lea.hbm %s4745_s23, %s3078_s19 }
0x13d6   : > { %p3886_p6 = pneg %p3885_p0  ;;  %p3892_p13 = por %p3891_p10, %p3890_p9 }
0x13d8   : > { %p3893_p12 = pnand %p3892_p13, %p3886_p6 }
0x13da   : > { %3896 = shalt.err (!%p3893_p12)
}
0x13db   : > { %s3897_s20 = scalar_lea.hbm %s4579_s25, 128  ;;  %s3901_s0 = scalar_lea.hbm %s4746_s29, 256 }
0x13dc   : > { %p3898_p1 = scmp.ne.s32.totalorder %s4579_s25, %s3897_s20  ;;  %p3902_p4 = scmp.lt.u32.totalorder %s4579_s25, %s4746_s29 }
0x13dd   : > { %p3903_p8 = scmp.lt.u32.totalorder %s3901_s0, %s3897_s20  ;;  %p3905_p5 = scmp.lt.u32.totalorder %s3897_s20, %s4579_s25 }
0x13de   : > { %p3899_p2 = pnand %p3898_p1, %p4744_p7 }
0x13df   : > { %p3904_p11 = por %p3903_p8, %p3902_p4 }
0x13e0   : > { %p3900_p3 = pneg %p3899_p2 }
0x13e1   : > { %p3906_p0 = por %p3905_p5, %p3904_p11 }
0x13e3   : > { %p3907_p6 = pnand %p3906_p0, %p3900_p3 }
0x13e5   : > { %3910 = shalt.err (!%p3907_p6)
}
0x13e6   : > { %3416 = dma.vmem_to_hbm [thread:$0]  (%p4744_p7), %s2720_s15, 128, %s4579_s25, %s4554_s27  }
0x13e7   : > { %s4747_s18 = sld [smem:[#allocation38_spill]]  ;;  %s3077_s24 = sshll.u32 %s4140_s2, 4 }
0x13e8   : > { %s722_s4 = scalar_lea.vmem [#allocation13], %s4420_s30  ;;  %s4748_s0 = sld [smem:[#allocation39_spill]] }
0x13e9   : > { %s2693_s19 = sshll.u32 %s722_s4, 4  ;;  %s2671_s27 = scalar_lea.sflag [#allocation4], %s4420_s30  ;;  %s4610_s19 = int_to_ptr.vmem [resolvable:$true] %s2693_s19 }
0x13ea   : > { %s3911_s25 = scalar_lea.vmem %s4610_s19, 16  ;;  %s4013_s2 = smov [#allocation13]  }
0x13eb   : > { %p3912_p9 = scmp.ne.s32.totalorder %s4610_s19, %s3911_s25  ;;  %s3915_s15 = sshll.u32 %s4013_s2, 4  ;;  %s3916_s15 = int_to_ptr.vmem [resolvable:$false] %s3915_s15 }
0x13ec   : > { %s3917_s3 = scalar_lea.vmem %s3916_s15, 32  ;;  %p3918_p12 = scmp.lt.s32.totalorder %s4610_s19, %s3916_s15 }
0x13ed   : > { %v2598_v1 = vld [vmem:[%s4747_s18] sm:$0x1]  ;;  %p3913_p10 = pnand %p3912_p9, %p4744_p7  ;;  %p3919_p1 = scmp.lt.s32.totalorder %s3917_s3, %s3911_s25 }
0x13ee   : > { %s4608_s5 = scalar_lea.hbm %s4748_s0, %s3077_s24 }
0x13ef   : > { %p3914_p13 = pneg %p3913_p10  ;;  %p3920_p2 = por %p3919_p1, %p3918_p12 }
0x13f1   : > { %p3921_p3 = pnand %p3920_p2, %p3914_p13 }
0x1494   : > { %v2665_v53 = vpop.f32.mrb[2].mxu0 }
0x1495   : > { %v2666_v25 = vadd.f32 %v2665_v53, %v2598_v1  ;;  %v3353_v26 = vpop.f32.mrb[3].mxu0 }
0x1497   : > { %2669 = vst [vmem:[%s722_s4] sm:$0x1] %v2666_v25 }
0x1498   : > { %3924 = shalt.err (!%p3921_p3)
}
0x1499   : > { %s3925_s30 = scalar_lea.hbm %s4608_s5, 16  ;;  %s3929_s18 = scalar_lea.hbm %s4748_s0, 32 }
0x149a   : > { %p3926_p4 = scmp.ne.s32.totalorder %s4608_s5, %s3925_s30  ;;  %p3930_p5 = scmp.lt.u32.totalorder %s4608_s5, %s4748_s0 }
0x149b   : > { %p3931_p0 = scmp.lt.u32.totalorder %s3929_s18, %s3925_s30  ;;  %p3933_p9 = scmp.lt.u32.totalorder %s3925_s30, %s4608_s5 }
0x149c   : > { %p3927_p8 = pnand %p3926_p4, %p4744_p7 }
0x149d   : > { %p3932_p6 = por %p3931_p0, %p3930_p5 }
0x149e   : > { %p3928_p11 = pneg %p3927_p8 }
0x149f   : > { %p3934_p10 = por %p3933_p9, %p3932_p6 }
0x14a1   : > { %p3935_p13 = pnand %p3934_p10, %p3928_p11 }
0x14a3   : > { %3938 = shalt.err (!%p3935_p13)
}
0x14a4   : > { %3414 = dma.vmem_to_hbm [thread:$0]  (%p4744_p7), %s4610_s19, 16, %s4608_s5, %s2671_s27  }
0x14a5 PF: > { %s4749_s20 = sld [smem:[#allocation25_spill]]  ;;  %s4750_s1 = sld [smem:[#allocation23_spill]] }
0x14a6   : > { %s4751_s25 = sld [smem:[#allocation29_spill]] }
0x14ab   : > { %p3461_p12 = scmp.ge.s32.totalorder %s4749_s20, 2  ;;  %s2731_s2 = sand.u32 1, %s4750_s1  }
0x14ac   : > { %p4752_p1 = scmp.ne.s32.totalorder %s4751_s25, 0  ;;  %s2732_s15 = scalar_lea.sflag [#allocation4], %s2731_s2 }
0x14ae   : > { %p3440_p2 = pnand %p3461_p12, %p4752_p1 }
0x14b0   : > { %3972 = dma.done.wait (!%p3440_p2), %s2732_s15, 16  }
0x14b1   : > { %3974 = vsyncadd (!%p3440_p2), %s2732_s15, 4294967280  ;;  %s4753_s3 = sadd.s32 4294967294, %s4749_s20  }
0x14b2   : > { %s2739_s30 = sand.u32 1, %s4753_s3  }
0x14b3   : > { %s2740_s6 = scalar_lea.sflag [#allocation15], %s2739_s30 }
0x14b4   : > { %3976 = dma.done.wait (!%p3440_p2), %s2740_s6, 256  }
0x14b5   : > { %3978 = vsyncadd (!%p3440_p2), %s2740_s6, 4294967040  ;;  %s4754_s24 = sld [smem:[#allocation26_spill]]  ;;  %s4755_s21 = sld [smem:[#allocation24_spill]] }
0x14b6   : > { %s4756_s23 = sld [smem:[#allocation27_spill]]  ;;  %s4757_s1 = smov %s3985_s22 }
0x14bb   : > { %p38_p7 = scmp.ge.s32.totalorder %s4754_s24, 4   ;;  %s4758_s22 = smov %s4755_s21 }
0x14bd   :  { %40 = sbr.rel (!%p38_p7) target bundleno = 22 (0x16), region = 199 }
0x14c4   :  { %2754 = vsyncpa [#allocation3], 1 }
0x14c5   :  { %2756 = vsyncpa [#allocation3 + $0x1], 1 }
0x14c6   :  { %2757 = vsyncpa [#allocation6], 1 }
0x14c7   :  { %2758 = vsyncpa [#allocation9], 1 }
0x14c8   :  { %2759 = vsyncpa [#allocation12], 1 }
0x14c9   :  { %2760 = vsyncpa [#allocation4], 1 }
0x14ca   :  { %2762 = vsyncpa [#allocation4 + $0x1], 1 }
0x14cb   :  { %2763 = vsyncpa [#allocation15], 1 }
0x14cc   :  { %2765 = vsyncpa [#allocation15 + $0x1], 1 }

</bundles_post_ra>
